<compile_context>
chip_gen: v7x
topology: tpu7x:2x2x1
jax: 0.10.0
libtpu: 0.0.40
codegen_flags: <defaults>
</compile_context>

<pallas_src>
import functools

import numpy as np
import jax
import jax.numpy as jnp
from jax import lax
from jax.experimental import pallas as pl
from jax.experimental.pallas import tpu as pltpu

_NEG_SLOPE = 0.01    # torch.nn.LeakyReLU default
_BN_EPS = 1e-5       # torch.nn.BatchNorm3d default

# Static geometry of the module (input hardcoded to (5, 5, 4)).
_IN_D, _IN_H, _IN_W = 5, 5, 4                 # 100 input voxels
_C1_D, _C1_H, _C1_W, _C1_C = 4, 4, 3, 8       # conv1 output -> 384 features
_C2_D, _C2_H, _C2_W, _C2_C = 3, 3, 2, 16      # conv2 output -> 288 features
_X_COLS = _IN_D * _IN_H * _IN_W               # 100
_X_PAD = 128                                  # lane-padded input width
_H1_COLS = _C1_D * _C1_H * _C1_W * _C1_C      # 384
_H2_COLS = _C2_D * _C2_H * _C2_W * _C2_C      # 288
_N_SPATIAL2 = _C2_D * _C2_H * _C2_W           # 18


def _leaky(x):
    return jnp.where(x > 0, x, _NEG_SLOPE * x)


def _round_up(a, b):
    return (a + b - 1) // b * b


# --------------------------------------------------------------------------
# Static index tables for the unrolled-convolution weight matrices (numpy,
# computed once at import; the actual scatter of parameter values is traced
# JAX glue inside the jitted forward).
# --------------------------------------------------------------------------
def _conv1_unroll_indices():
    rows, cols, co_i, kd_i, kh_i, kw_i = [], [], [], [], [], []
    for od in range(_C1_D):
        for oh in range(_C1_H):
            for ow in range(_C1_W):
                for kd in range(2):
                    for kh in range(2):
                        for kw in range(2):
                            r = ((od + kd) * _IN_H + (oh + kh)) * _IN_W + (ow + kw)
                            for co in range(_C1_C):
                                c = ((od * _C1_H + oh) * _C1_W + ow) * _C1_C + co
                                rows.append(r); cols.append(c)
                                co_i.append(co); kd_i.append(kd)
                                kh_i.append(kh); kw_i.append(kw)
    return tuple(np.asarray(v, np.int32) for v in (rows, cols, co_i, kd_i, kh_i, kw_i))


def _conv2_unroll_indices():
    rows, cols, co_i, ci_i, kd_i, kh_i, kw_i = [], [], [], [], [], [], []
    for od in range(_C2_D):
        for oh in range(_C2_H):
            for ow in range(_C2_W):
                for kd in range(2):
                    for kh in range(2):
                        for kw in range(2):
                            idp, ihp, iwp = od + kd, oh + kh, ow + kw
                            for ci in range(_C1_C):
                                r = ((idp * _C1_H + ihp) * _C1_W + iwp) * _C1_C + ci
                                for co in range(_C2_C):
                                    c = ((od * _C2_H + oh) * _C2_W + ow) * _C2_C + co
                                    rows.append(r); cols.append(c)
                                    co_i.append(co); ci_i.append(ci)
                                    kd_i.append(kd); kh_i.append(kh); kw_i.append(kw)
    return tuple(np.asarray(v, np.int32) for v in
                 (rows, cols, co_i, ci_i, kd_i, kh_i, kw_i))


_C1_IDX = _conv1_unroll_indices()
_C2_IDX = _conv2_unroll_indices()


def _unroll_conv_weights(w1, w2):
    """Dense 'unrolled convolution' matrices (plain-JAX glue, O(params) work)."""
    r1, c1, co1, kd1, kh1, kw1 = _C1_IDX
    vals1 = w1[co1, 0, kd1, kh1, kw1]
    w1u = jnp.zeros((_X_PAD, _H1_COLS), jnp.float32).at[r1, c1].set(vals1)
    r2, c2, co2, ci2, kd2, kh2, kw2 = _C2_IDX
    vals2 = w2[co2, ci2, kd2, kh2, kw2]
    w2u = jnp.zeros((_H1_COLS, _H2_COLS), jnp.float32).at[r2, c2].set(vals2)
    return w1u, w2u


# --------------------------------------------------------------------------
# Kernels
# --------------------------------------------------------------------------
def _conv_stats_kernel(x_ref, w1_ref, b1_ref, w2_ref, b2_ref,
                       h2_ref, stats_ref, *, n_valid):
    """conv1 -> conv2 (both as MXU matmuls) + per-tile BN partial statistics."""
    x = x_ref[...]                                                  # (TN, 128)
    h1 = _leaky(jnp.dot(x, w1_ref[...],
                        preferred_element_type=jnp.float32) + b1_ref[...])   # (TN, 384)
    h2 = _leaky(jnp.dot(h1, w2_ref[...],
                        preferred_element_type=jnp.float32) + b2_ref[...])   # (TN, 288)
    h2_ref[...] = h2

    # Per-tile partial sums / sums-of-squares for BatchNorm batch statistics.
    # Rows that are batch padding (ragged last tile) are masked out.
    tn = h2.shape[0]
    row = lax.broadcasted_iota(jnp.int32, (tn, 1), 0)
    valid = (pl.program_id(0) * tn + row) < n_valid                 # (TN, 1) bool
    h2v = jnp.where(valid, h2, 0.0)
    stats_ref[0, 0:1, :] = jnp.sum(h2v, axis=0, keepdims=True)      # (1, 288)
    stats_ref[0, 1:2, :] = jnp.sum(h2v * h2v, axis=0, keepdims=True)


def _bn_head_kernel(h2_ref, scale_ref, shift_ref, fc1w_ref, fc1b_ref,
                    fc2w_ref, fc2b_ref, out_ref):
    """BN affine (global stats) -> fc1 (MXU) -> LeakyReLU -> fc2 -> sigmoid."""
    h2n = h2_ref[...] * scale_ref[...] + shift_ref[...]             # (TN, 288)
    fc1 = _leaky(jnp.dot(h2n, fc1w_ref[...],
                         preferred_element_type=jnp.float32) + fc1b_ref[...])  # (TN, 16)
    # fc2 (16 -> 1): VPU multiply + lane-axis reduction (avoids a degenerate
    # K=16, N=1 MXU op).
    logits = jnp.sum(fc1 * fc2w_ref[...], axis=1, keepdims=True) + fc2b_ref[...]
    out_ref[...] = jax.nn.sigmoid(logits)                           # (TN, 1)


# --------------------------------------------------------------------------
# Forward wrapper
# --------------------------------------------------------------------------
@functools.partial(jax.jit, static_argnames=("tile_n",))
def damage_conv3d_forward(x, p, *, tile_n=1024):
    """x: (N, 5, 5, 4) float32 -> (N, 1) sigmoid scores (train-mode BatchNorm)."""
    n = x.shape[0]
    tn = min(_round_up(n, 8), _round_up(tile_n, 8))
    n_pad = _round_up(n, tn)
    n_tiles = n_pad // tn

    # ---- plain-JAX glue: layout plumbing + weight unrolling only ------------
    x_flat = x.reshape(n, _X_COLS).astype(jnp.float32)
    x_pad = jnp.zeros((n_pad, _X_PAD), jnp.float32).at[:n, :_X_COLS].set(x_flat)

    w1u, w2u = _unroll_conv_weights(p["w1"], p["w2"])
    b1u = jnp.tile(p["b1"], _C1_D * _C1_H * _C1_W).reshape(1, _H1_COLS)
    b2u = jnp.tile(p["b2"], _N_SPATIAL2).reshape(1, _H2_COLS)

    # fc1 weight: torch flattens NCDHW (channel-major); our h2 columns are
    # (d, h, w, c) minor-to-major on the lane axis -> permute columns.
    fc1w = jnp.transpose(
        p["fc1_w"].reshape(16, _C2_C, _C2_D, _C2_H, _C2_W),
        (2, 3, 4, 1, 0)).reshape(_H2_COLS, 16)
    fc1b = p["fc1_b"].reshape(1, 16)
    fc2w = p["fc2_w"].reshape(1, 16)
    fc2b = p["fc2_b"].reshape(1, 1)

    cparams = pltpu.CompilerParams(
        dimension_semantics=("parallel",),
        vmem_limit_bytes=32 * 1024 * 1024)

    # ---- pass 1: conv1 + conv2 on the MXU, per-tile BN partial stats --------
    h2_pad, stats = pl.pallas_call(
        functools.partial(_conv_stats_kernel, n_valid=n),
        grid=(n_tiles,),
        in_specs=[
            pl.BlockSpec((tn, _X_PAD), lambda i: (i, 0)),
            pl.BlockSpec((_X_PAD, _H1_COLS), lambda i: (0, 0)),
            pl.BlockSpec((1, _H1_COLS), lambda i: (0, 0)),
            pl.BlockSpec((_H1_COLS, _H2_COLS), lambda i: (0, 0)),
            pl.BlockSpec((1, _H2_COLS), lambda i: (0, 0)),
        ],
        out_specs=(
            pl.BlockSpec((tn, _H2_COLS), lambda i: (i, 0)),
            pl.BlockSpec((1, 2, _H2_COLS), lambda i: (i, 0, 0)),
        ),
        out_shape=(
            jax.ShapeDtypeStruct((n_pad, _H2_COLS), jnp.float32),
            jax.ShapeDtypeStruct((n_tiles, 2, _H2_COLS), jnp.float32),
        ),
        compiler_params=cparams,
    )(x_pad, w1u, b1u, w2u, b2u)

    # ---- BN statistics finalize: tiny cross-tile reduction (XLA glue) -------
    col_stats = jnp.sum(stats, axis=0)                                   # (2, 288)
    ch_stats = col_stats.reshape(2, _N_SPATIAL2, _C2_C).sum(axis=1)      # (2, 16)
    count = float(n * _N_SPATIAL2)
    mean = ch_stats[0] / count
    var = ch_stats[1] / count - mean * mean                  # biased, as torch uses
    scale = p["gamma"] * lax.rsqrt(var + _BN_EPS)            # (16,)
    shift = p["beta"] - mean * scale
    scale288 = jnp.tile(scale, _N_SPATIAL2).reshape(1, _H2_COLS)
    shift288 = jnp.tile(shift, _N_SPATIAL2).reshape(1, _H2_COLS)

    # ---- pass 2: BN affine + fc1 + LeakyReLU + fc2 + sigmoid ----------------
    out_pad = pl.pallas_call(
        _bn_head_kernel,
        grid=(n_tiles,),
        in_specs=[
            pl.BlockSpec((tn, _H2_COLS), lambda i: (i, 0)),
            pl.BlockSpec((1, _H2_COLS), lambda i: (0, 0)),
            pl.BlockSpec((1, _H2_COLS), lambda i: (0, 0)),
            pl.BlockSpec((_H2_COLS, 16), lambda i: (0, 0)),
            pl.BlockSpec((1, 16), lambda i: (0, 0)),
            pl.BlockSpec((1, 16), lambda i: (0, 0)),
            pl.BlockSpec((1, 1), lambda i: (0, 0)),
        ],
        out_specs=pl.BlockSpec((tn, 1), lambda i: (i, 0)),
        out_shape=jax.ShapeDtypeStruct((n_pad, 1), jnp.float32),
        compiler_params=cparams,
    )(h2_pad, scale288, shift288, fc1w, fc1b, fc2w, fc2b)

    return out_pad[:n]


# --------------------------------------------------------------------------
# Parameter init (matches DamageConv3D.__init__ shapes) and pure-JAX reference
# --------------------------------------------------------------------------
def init_params(key):
    ks = jax.random.split(key, 10)
    p = {}
    p["w1"] = 0.3 * jax.random.normal(ks[0], (8, 1, 2, 2, 2), jnp.float32)   # conv1
    p["b1"] = 0.1 * jax.random.normal(ks[1], (8,), jnp.float32)
    p["w2"] = 0.2 * jax.random.normal(ks[2], (16, 8, 2, 2, 2), jnp.float32)  # conv2
    p["b2"] = 0.1 * jax.random.normal(ks[3], (16,), jnp.float32)
    p["gamma"] = 1.0 + 0.1 * jax.random.normal(ks[4], (16,), jnp.float32)    # bn
    p["beta"] = 0.1 * jax.random.normal(ks[5], (16,), jnp.float32)
    p["fc1_w"] = 0.1 * jax.random.normal(ks[6], (16, 288), jnp.float32)      # fc1
    p["fc1_b"] = 0.1 * jax.random.normal(ks[7], (16,), jnp.float32)
    p["fc2_w"] = 0.1 * jax.random.normal(ks[8], (1, 16), jnp.float32)        # fc2
    p["fc2_b"] = 0.1 * jax.random.normal(ks[9], (1,), jnp.float32)
    return p


def damage_conv3d_reference(x, p):
    """Pure-JAX reference mirroring the PyTorch forward (NCDHW)."""
    n = x.shape[0]
    y = x[:, None, :, :, :]                                           # unsqueeze(1)
    dn = ("NCDHW", "OIDHW", "NCDHW")
    y = lax.conv_general_dilated(y, p["w1"], (1, 1, 1), "VALID", dimension_numbers=dn)
    y = jax.nn.leaky_relu(y + p["b1"][None, :, None, None, None], _NEG_SLOPE)
    y = lax.conv_general_dilated(y, p["w2"], (1, 1, 1), "VALID", dimension_numbers=dn)
    y = jax.nn.leaky_relu(y + p["b2"][None, :, None, None, None], _NEG_SLOPE)
    mean = jnp.mean(y, axis=(0, 2, 3, 4), keepdims=True)
    var = jnp.mean((y - mean) ** 2, axis=(0, 2, 3, 4), keepdims=True)
    y = (y - mean) / jnp.sqrt(var + _BN_EPS)
    y = y * p["gamma"][None, :, None, None, None] + p["beta"][None, :, None, None, None]
    y = y.reshape(n, 288)                                             # Flatten
    y = jax.nn.leaky_relu(y @ p["fc1_w"].T + p["fc1_b"], _NEG_SLOPE)
    y = y @ p["fc2_w"].T + p["fc2_b"]
    return jax.nn.sigmoid(y)


if __name__ == "__main__":
    key = jax.random.PRNGKey(0)
    kx, kp = jax.random.split(key)
    batch = 40                          # ragged vs the small demo tile below ->
                                        # exercises multi-tile BN stats + masking
    x = jax.random.normal(kx, (batch, 5, 5, 4), jnp.float32)   # module hardcodes (5,5,4)
    params = init_params(kp)

    ref = jax.block_until_ready(damage_conv3d_reference(x, params))

    # Multi-tile path (3 tiles, ragged last tile).
    out = jax.block_until_ready(damage_conv3d_forward(x, params, tile_n=16))
    assert out.shape == (batch, 1), out.shape
    err = float(jnp.max(jnp.abs(out - ref)))
    assert err < 2e-3, f"kernel/reference mismatch: max abs err = {err}"

    # Default (large) tile path.
    out2 = jax.block_until_ready(damage_conv3d_forward(x, params))
    err2 = float(jnp.max(jnp.abs(out2 - ref)))
    assert err2 < 2e-3, f"kernel/reference mismatch (default tile): max abs err = {err2}"

    print("KERNEL_OK")
</pallas_src>

<mosaic_0001>
module attributes {stable_mosaic.version = 11 : i64} {
  func.func @_conv_stats_kernel(%arg0: i32, %arg1: memref<16x128xf32, #tpu.memory_space<vmem>>, %arg2: memref<128x384xf32, #tpu.memory_space<vmem>>, %arg3: memref<1x384xf32, #tpu.memory_space<vmem>>, %arg4: memref<384x288xf32, #tpu.memory_space<vmem>>, %arg5: memref<1x288xf32, #tpu.memory_space<vmem>>, %arg6: memref<16x288xf32, #tpu.memory_space<vmem>>, %arg7: memref<1x2x288xf32, #tpu.memory_space<vmem>>) attributes {dimension_semantics = [#tpu.dimension_semantics<parallel>], iteration_bounds = array<i64: 3>, scalar_prefetch = 0 : i64, scratch_operands = 0 : i64, tpu.core_type = #tpu.core_type<tc>, window_params = [{transform_indices = @transform_0, window_bounds = array<i64: 16, 128>}, {pipeline_mode = #tpu.pipeline_mode<synchronous>, transform_indices = @transform_1, window_bounds = array<i64: 128, 384>}, {pipeline_mode = #tpu.pipeline_mode<synchronous>, transform_indices = @transform_2, window_bounds = array<i64: 1, 384>}, {pipeline_mode = #tpu.pipeline_mode<synchronous>, transform_indices = @transform_3, window_bounds = array<i64: 384, 288>}, {pipeline_mode = #tpu.pipeline_mode<synchronous>, transform_indices = @transform_4, window_bounds = array<i64: 1, 288>}, {transform_indices = @transform_5, window_bounds = array<i64: 16, 288>}, {transform_indices = @transform_6, window_bounds = array<i64: 1, 2, 288>}]} {
    %c0 = arith.constant 0 : index
    %c0_0 = arith.constant 0 : index
    %0 = vector.load %arg1[%c0, %c0_0] : memref<16x128xf32, #tpu.memory_space<vmem>>, vector<16x128xf32>
    %c0_1 = arith.constant 0 : index
    %c0_2 = arith.constant 0 : index
    %1 = vector.load %arg2[%c0_1, %c0_2] : memref<128x384xf32, #tpu.memory_space<vmem>>, vector<128x384xf32>
    %cst = arith.constant dense<0.000000e+00> : vector<16x384xf32>
    %2 = tpu.matmul %0, %1, %cst {dimension_numbers = #tpu.dot_dimension_numbers<[1], [0], [0], [1], [0, 0, 1, 1], [], []>} : vector<16x128xf32>, vector<128x384xf32>, vector<16x384xf32> -> vector<16x384xf32>
    %c0_3 = arith.constant 0 : index
    %c0_4 = arith.constant 0 : index
    %3 = vector.load %arg3[%c0_3, %c0_4] : memref<1x384xf32, #tpu.memory_space<vmem>>, vector<1x384xf32>
    %4 = vector.broadcast %3 : vector<1x384xf32> to vector<16x384xf32>
    %5 = arith.addf %2, %4 : vector<16x384xf32>
    %cst_5 = arith.constant 0.000000e+00 : f32
    %6 = vector.broadcast %cst_5 : f32 to vector<16x384xf32>
    %7 = arith.cmpf ogt, %5, %6 : vector<16x384xf32>
    %cst_6 = arith.constant 0.00999999977 : f32
    %8 = vector.broadcast %cst_6 : f32 to vector<16x384xf32>
    %9 = arith.mulf %8, %5 : vector<16x384xf32>
    %10 = arith.select %7, %5, %9 : vector<16x384xi1>, vector<16x384xf32>
    %c0_7 = arith.constant 0 : index
    %c0_8 = arith.constant 0 : index
    %11 = vector.load %arg4[%c0_7, %c0_8] : memref<384x288xf32, #tpu.memory_space<vmem>>, vector<384x288xf32>
    %cst_9 = arith.constant dense<0.000000e+00> : vector<16x288xf32>
    %12 = tpu.matmul %10, %11, %cst_9 {dimension_numbers = #tpu.dot_dimension_numbers<[1], [0], [0], [1], [0, 0, 1, 1], [], []>} : vector<16x384xf32>, vector<384x288xf32>, vector<16x288xf32> -> vector<16x288xf32>
    %c0_10 = arith.constant 0 : index
    %c0_11 = arith.constant 0 : index
    %13 = vector.load %arg5[%c0_10, %c0_11] : memref<1x288xf32, #tpu.memory_space<vmem>>, vector<1x288xf32>
    %14 = vector.broadcast %13 : vector<1x288xf32> to vector<16x288xf32>
    %15 = arith.addf %12, %14 : vector<16x288xf32>
    %cst_12 = arith.constant 0.000000e+00 : f32
    %16 = vector.broadcast %cst_12 : f32 to vector<16x288xf32>
    %17 = arith.cmpf ogt, %15, %16 : vector<16x288xf32>
    %cst_13 = arith.constant 0.00999999977 : f32
    %18 = vector.broadcast %cst_13 : f32 to vector<16x288xf32>
    %19 = arith.mulf %18, %15 : vector<16x288xf32>
    %20 = arith.select %17, %15, %19 : vector<16x288xi1>, vector<16x288xf32>
    %c0_14 = arith.constant 0 : index
    %c0_15 = arith.constant 0 : index
    %21 = vector.load %arg6[%c0_14, %c0_15] : memref<16x288xf32, #tpu.memory_space<vmem>>, vector<16x288xf32>
    tpu.vector_store %arg6[%c0_14, %c0_15], %20 {strides = array<i32>} : memref<16x288xf32, #tpu.memory_space<vmem>>, vector<16x288xf32>,
    %22 = tpu.iota {dimensions = array<i32: 0>} : vector<16x1xi32>
    %c16_i32 = arith.constant 16 : i32
    %23 = arith.muli %arg0, %c16_i32 : i32
    %24 = vector.broadcast %23 : i32 to vector<16x1xi32>
    %25 = arith.addi %24, %22 : vector<16x1xi32>
    %c40_i32 = arith.constant 40 : i32
    %26 = vector.broadcast %c40_i32 : i32 to vector<16x1xi32>
    %27 = arith.cmpi slt, %25, %26 : vector<16x1xi32>
    %cst_16 = arith.constant 0.000000e+00 : f32
    %28 = vector.shape_cast %27 : vector<16x1xi1> to vector<16x1xi1>
    %29 = vector.broadcast %28 : vector<16x1xi1> to vector<16x288xi1>
    %30 = vector.broadcast %cst_16 : f32 to vector<16x288xf32>
    %31 = arith.select %29, %20, %30 : vector<16x288xi1>, vector<16x288xf32>
    %cst_17 = arith.constant dense<0.000000e+00> : vector<288xf32>
    %32 = vector.multi_reduction <add>, %31, %cst_17 [0] : vector<16x288xf32> to vector<288xf32>
    %33 = vector.shape_cast %32 : vector<288xf32> to vector<1x288xf32>
    %c0_18 = arith.constant 0 : index
    %c0_19 = arith.constant 0 : index
    %c0_20 = arith.constant 0 : index
    %34 = vector.load %arg7[%c0_18, %c0_19, %c0_20] : memref<1x2x288xf32, #tpu.memory_space<vmem>>, vector<1x1x288xf32>
    %35 = vector.shape_cast %34 : vector<1x1x288xf32> to vector<1x288xf32>
    %36 = vector.shape_cast %33 : vector<1x288xf32> to vector<1x1x288xf32>
    tpu.vector_store %arg7[%c0_18, %c0_19, %c0_20], %36 {strides = array<i32>} : memref<1x2x288xf32, #tpu.memory_space<vmem>>, vector<1x1x288xf32>,
    %37 = arith.mulf %31, %31 : vector<16x288xf32>
    %cst_21 = arith.constant dense<0.000000e+00> : vector<288xf32>
    %38 = vector.multi_reduction <add>, %37, %cst_21 [0] : vector<16x288xf32> to vector<288xf32>
    %39 = vector.shape_cast %38 : vector<288xf32> to vector<1x288xf32>
    %c0_22 = arith.constant 0 : index
    %c1 = arith.constant 1 : index
    %c0_23 = arith.constant 0 : index
    %40 = vector.load %arg7[%c0_22, %c1, %c0_23] : memref<1x2x288xf32, #tpu.memory_space<vmem>>, vector<1x1x288xf32>
    %41 = vector.shape_cast %40 : vector<1x1x288xf32> to vector<1x288xf32>
    %42 = vector.shape_cast %39 : vector<1x288xf32> to vector<1x1x288xf32>
    tpu.vector_store %arg7[%c0_22, %c1, %c0_23], %42 {strides = array<i32>} : memref<1x2x288xf32, #tpu.memory_space<vmem>>, vector<1x1x288xf32>,
    return
  }
  func.func @transform_0(%arg0: i32) -> (i32, i32) {
    %c0_i32 = arith.constant 0 : i32
    %c0_i32_0 = arith.constant 0 : i32
    return %arg0, %c0_i32 : i32, i32
  }
  func.func @transform_1(%arg0: i32) -> (i32, i32) {
    %c0_i32 = arith.constant 0 : i32
    %c0_i32_0 = arith.constant 0 : i32
    %c0_i32_1 = arith.constant 0 : i32
    return %c0_i32, %c0_i32_0 : i32, i32
  }
  func.func @transform_2(%arg0: i32) -> (i32, i32) {
    %c0_i32 = arith.constant 0 : i32
    %c0_i32_0 = arith.constant 0 : i32
    %c0_i32_1 = arith.constant 0 : i32
    return %c0_i32, %c0_i32_0 : i32, i32
  }
  func.func @transform_3(%arg0: i32) -> (i32, i32) {
    %c0_i32 = arith.constant 0 : i32
    %c0_i32_0 = arith.constant 0 : i32
    %c0_i32_1 = arith.constant 0 : i32
    return %c0_i32, %c0_i32_0 : i32, i32
  }
  func.func @transform_4(%arg0: i32) -> (i32, i32) {
    %c0_i32 = arith.constant 0 : i32
    %c0_i32_0 = arith.constant 0 : i32
    %c0_i32_1 = arith.constant 0 : i32
    return %c0_i32, %c0_i32_0 : i32, i32
  }
  func.func @transform_5(%arg0: i32) -> (i32, i32) {
    %c0_i32 = arith.constant 0 : i32
    %c0_i32_0 = arith.constant 0 : i32
    return %arg0, %c0_i32 : i32, i32
  }
  func.func @transform_6(%arg0: i32) -> (i32, i32, i32) {
    %c0_i32 = arith.constant 0 : i32
    %c0_i32_0 = arith.constant 0 : i32
    %c0_i32_1 = arith.constant 0 : i32
    return %arg0, %c0_i32, %c0_i32_0 : i32, i32, i32
  }
}

module attributes {stable_mosaic.version = 11 : i64} {
  func.func @_bn_head_kernel(%arg0: i32, %arg1: memref<16x288xf32, #tpu.memory_space<vmem>>, %arg2: memref<1x288xf32, #tpu.memory_space<vmem>>, %arg3: memref<1x288xf32, #tpu.memory_space<vmem>>, %arg4: memref<288x16xf32, #tpu.memory_space<vmem>>, %arg5: memref<1x16xf32, #tpu.memory_space<vmem>>, %arg6: memref<1x16xf32, #tpu.memory_space<vmem>>, %arg7: memref<1x1xf32, #tpu.memory_space<vmem>>, %arg8: memref<16x1xf32, #tpu.memory_space<vmem>>) attributes {dimension_semantics = [#tpu.dimension_semantics<parallel>], iteration_bounds = array<i64: 3>, scalar_prefetch = 0 : i64, scratch_operands = 0 : i64, tpu.core_type = #tpu.core_type<tc>, window_params = [{transform_indices = @transform_0, window_bounds = array<i64: 16, 288>}, {pipeline_mode = #tpu.pipeline_mode<synchronous>, transform_indices = @transform_1, window_bounds = array<i64: 1, 288>}, {pipeline_mode = #tpu.pipeline_mode<synchronous>, transform_indices = @transform_2, window_bounds = array<i64: 1, 288>}, {pipeline_mode = #tpu.pipeline_mode<synchronous>, transform_indices = @transform_3, window_bounds = array<i64: 288, 16>}, {pipeline_mode = #tpu.pipeline_mode<synchronous>, transform_indices = @transform_4, window_bounds = array<i64: 1, 16>}, {pipeline_mode = #tpu.pipeline_mode<synchronous>, transform_indices = @transform_5, window_bounds = array<i64: 1, 16>}, {pipeline_mode = #tpu.pipeline_mode<synchronous>, transform_indices = @transform_6, window_bounds = array<i64: 1, 1>}, {transform_indices = @transform_7, window_bounds = array<i64: 16, 1>}]} {
    %c0 = arith.constant 0 : index
    %c0_0 = arith.constant 0 : index
    %0 = vector.load %arg1[%c0, %c0_0] : memref<16x288xf32, #tpu.memory_space<vmem>>, vector<16x288xf32>
    %c0_1 = arith.constant 0 : index
    %c0_2 = arith.constant 0 : index
    %1 = vector.load %arg2[%c0_1, %c0_2] : memref<1x288xf32, #tpu.memory_space<vmem>>, vector<1x288xf32>
    %2 = vector.broadcast %1 : vector<1x288xf32> to vector<16x288xf32>
    %3 = arith.mulf %0, %2 : vector<16x288xf32>
    %c0_3 = arith.constant 0 : index
    %c0_4 = arith.constant 0 : index
    %4 = vector.load %arg3[%c0_3, %c0_4] : memref<1x288xf32, #tpu.memory_space<vmem>>, vector<1x288xf32>
    %5 = vector.broadcast %4 : vector<1x288xf32> to vector<16x288xf32>
    %6 = arith.addf %3, %5 : vector<16x288xf32>
    %c0_5 = arith.constant 0 : index
    %c0_6 = arith.constant 0 : index
    %7 = vector.load %arg4[%c0_5, %c0_6] : memref<288x16xf32, #tpu.memory_space<vmem>>, vector<288x16xf32>
    %cst = arith.constant dense<0.000000e+00> : vector<16x16xf32>
    %8 = tpu.matmul %6, %7, %cst {dimension_numbers = #tpu.dot_dimension_numbers<[1], [0], [0], [1], [0, 0, 1, 1], [], []>} : vector<16x288xf32>, vector<288x16xf32>, vector<16x16xf32> -> vector<16x16xf32>
    %c0_7 = arith.constant 0 : index
    %c0_8 = arith.constant 0 : index
    %9 = vector.load %arg5[%c0_7, %c0_8] : memref<1x16xf32, #tpu.memory_space<vmem>>, vector<1x16xf32>
    %10 = vector.broadcast %9 : vector<1x16xf32> to vector<16x16xf32>
    %11 = arith.addf %8, %10 : vector<16x16xf32>
    %cst_9 = arith.constant 0.000000e+00 : f32
    %12 = vector.broadcast %cst_9 : f32 to vector<16x16xf32>
    %13 = arith.cmpf ogt, %11, %12 : vector<16x16xf32>
    %cst_10 = arith.constant 0.00999999977 : f32
    %14 = vector.broadcast %cst_10 : f32 to vector<16x16xf32>
    %15 = arith.mulf %14, %11 : vector<16x16xf32>
    %16 = arith.select %13, %11, %15 : vector<16x16xi1>, vector<16x16xf32>
    %c0_11 = arith.constant 0 : index
    %c0_12 = arith.constant 0 : index
    %17 = vector.load %arg6[%c0_11, %c0_12] : memref<1x16xf32, #tpu.memory_space<vmem>>, vector<1x16xf32>
    %18 = vector.broadcast %17 : vector<1x16xf32> to vector<16x16xf32>
    %19 = arith.mulf %16, %18 : vector<16x16xf32>
    %cst_13 = arith.constant dense<0.000000e+00> : vector<16xf32>
    %20 = vector.multi_reduction <add>, %19, %cst_13 [1] : vector<16x16xf32> to vector<16xf32>
    %21 = vector.shape_cast %20 : vector<16xf32> to vector<16x1xf32>
    %c0_14 = arith.constant 0 : index
    %c0_15 = arith.constant 0 : index
    %22 = vector.load %arg7[%c0_14, %c0_15] : memref<1x1xf32, #tpu.memory_space<vmem>>, vector<1x1xf32>
    %23 = vector.broadcast %22 : vector<1x1xf32> to vector<16x1xf32>
    %24 = arith.addf %21, %23 : vector<16x1xf32>
    %25 = arith.negf %24 : vector<16x1xf32>
    %26 = math.exp %25 : vector<16x1xf32>
    %cst_16 = arith.constant 1.000000e+00 : f32
    %27 = vector.broadcast %cst_16 : f32 to vector<16x1xf32>
    %28 = arith.addf %27, %26 : vector<16x1xf32>
    %29 = arith.divf %27, %28 : vector<16x1xf32>
    %c0_17 = arith.constant 0 : index
    %c0_18 = arith.constant 0 : index
    %30 = vector.load %arg8[%c0_17, %c0_18] : memref<16x1xf32, #tpu.memory_space<vmem>>, vector<16x1xf32>
    tpu.vector_store %arg8[%c0_17, %c0_18], %29 {strides = array<i32>} : memref<16x1xf32, #tpu.memory_space<vmem>>, vector<16x1xf32>,
    return
  }
  func.func @transform_0(%arg0: i32) -> (i32, i32) {
    %c0_i32 = arith.constant 0 : i32
    %c0_i32_0 = arith.constant 0 : i32
    return %arg0, %c0_i32 : i32, i32
  }
  func.func @transform_1(%arg0: i32) -> (i32, i32) {
    %c0_i32 = arith.constant 0 : i32
    %c0_i32_0 = arith.constant 0 : i32
    %c0_i32_1 = arith.constant 0 : i32
    return %c0_i32, %c0_i32_0 : i32, i32
  }
  func.func @transform_2(%arg0: i32) -> (i32, i32) {
    %c0_i32 = arith.constant 0 : i32
    %c0_i32_0 = arith.constant 0 : i32
    %c0_i32_1 = arith.constant 0 : i32
    return %c0_i32, %c0_i32_0 : i32, i32
  }
  func.func @transform_3(%arg0: i32) -> (i32, i32) {
    %c0_i32 = arith.constant 0 : i32
    %c0_i32_0 = arith.constant 0 : i32
    %c0_i32_1 = arith.constant 0 : i32
    return %c0_i32, %c0_i32_0 : i32, i32
  }
  func.func @transform_4(%arg0: i32) -> (i32, i32) {
    %c0_i32 = arith.constant 0 : i32
    %c0_i32_0 = arith.constant 0 : i32
    %c0_i32_1 = arith.constant 0 : i32
    return %c0_i32, %c0_i32_0 : i32, i32
  }
  func.func @transform_5(%arg0: i32) -> (i32, i32) {
    %c0_i32 = arith.constant 0 : i32
    %c0_i32_0 = arith.constant 0 : i32
    %c0_i32_1 = arith.constant 0 : i32
    return %c0_i32, %c0_i32_0 : i32, i32
  }
  func.func @transform_6(%arg0: i32) -> (i32, i32) {
    %c0_i32 = arith.constant 0 : i32
    %c0_i32_0 = arith.constant 0 : i32
    %c0_i32_1 = arith.constant 0 : i32
    return %c0_i32, %c0_i32_0 : i32, i32
  }
  func.func @transform_7(%arg0: i32) -> (i32, i32) {
    %c0_i32 = arith.constant 0 : i32
    %c0_i32_0 = arith.constant 0 : i32
    return %arg0, %c0_i32 : i32, i32
  }
}

</mosaic_0001>

<bundles_post_ra>
// kernel: tile.23
= control target key start
LH: loop header
LB: loop body
LE: loop exit
PB: predicated region body
PF: predicated region fallthrough
CT: control target
= control target key end

     0   :  { %s52_s0 = inlined_call_operand.vmem [shape: f32[8], index: 0, kind: input, shape index: {}]   ;;  %s53_s1 = inlined_call_operand.vmem [shape: f32[48,8], index: 1, kind: output, shape index: {}]  }
   0x1   :  { %v4_v0 = vld [vmem:[%s52_s0] ss:$0 sm:$0xff] }
   0x2   :  { %5 = vst [vmem:[%s53_s1] sm:$0xff] %v4_v0  ;;  %16 = vst [vmem:[%s53_s1 + $0x8] sm:$0xff] %v4_v0 }
   0x3   :  { %17 = vst [vmem:[%s53_s1 + $0x10] sm:$0xff] %v4_v0  ;;  %18 = vst [vmem:[%s53_s1 + $0x18] sm:$0xff] %v4_v0 }
   0x4   :  { %19 = vst [vmem:[%s53_s1 + $0x20] sm:$0xff] %v4_v0  ;;  %20 = vst [vmem:[%s53_s1 + $0x28] sm:$0xff] %v4_v0 }

// kernel: tile.24
= control target key start
LH: loop header
LB: loop body
LE: loop exit
PB: predicated region body
PF: predicated region fallthrough
CT: control target
= control target key end

     0   :  { %vm6_vm0 = vcmask 1042434   ;;  %s11_s6 = smov 3  ;;  %s33_s11 = smov 3  ;;  %vm8_vm1 = vcmask 64512   ;;  %vm19_vm2 = vcmask 1048512   ;;  %vm30_vm3 = vcmask 982912   ;;  %s387_s0 = inlined_call_operand.vmem [shape: f32[48,8], index: 0, kind: input, shape index: {}]   ;;  %s388_s1 = inlined_call_operand.vmem [shape: f32[1,384], index: 1, kind: output, shape index: {}]  }
   0x1   :  { %v195_v0 = vld [vmem:[%s387_s0 + $0x2d] sm:$0x4]   ;;  %v199_v2 = vld [vmem:[%s387_s0 + $0x2b] sm:$0x4]   ;;  %s22_s16 = smov 3  ;;  %s241_s19 = smov 120  }
   0x2   :  { %v194_v1 = vld [vmem:[%s387_s0 + $0xf] ss:$16 sm:%s11_s6]   ;;  %v198_v4 = vld [vmem:[%s387_s0 + $0xd] ss:$16 sm:%s33_s11]   ;;  %s44_s22 = smov 3  ;;  %s242_s25 = smov 104  }
   0x3   :  { %v16_v3 = vsel %vm6_vm0, %v195_v0, %v194_v1  ;;  %v197_v5 = vld [vmem:[%s387_s0 + $0x2c] sm:$0x4]   ;;  %v38_v6 = vsel %vm6_vm0, %v199_v2, %v198_v4  ;;  %v201_v8 = vld [vmem:[%s387_s0 + $0x2a] sm:$0x4]   ;;  %s55_s28 = smov 3  ;;  %s66_s4 = smov 3 }
   0x4   :  { %17 = vrot.lane.b32.xlu0 %v16_v3, %s241_s19  ;;  %v196_v7 = vld [vmem:[%s387_s0 + $0xe] ss:$16 sm:%s22_s16]   ;;  %39 = vrot.lane.b32.xlu1 %v38_v6, %s242_s25  ;;  %s77_s9 = smov 3  ;;  %s243_s10 = smov 112   ;;  %vm41_vm4 = vcmask 917312   ;;  %vm52_vm5 = vcmask 851712  }
   0x5   :  { %v27_v9 = vsel %vm6_vm0, %v197_v5, %v196_v7  ;;  %v200_v10 = vld [vmem:[%s387_s0 + $0xc] ss:$16 sm:%s44_s22]   ;;  %v202_v12 = vld [vmem:[%s387_s0 + $0xb] ss:$16 sm:%s55_s28]   ;;  %s88_s11 = smov 3  ;;  %s244_s12 = smov 96  }
   0x6   :  { %v49_v11 = vsel %vm6_vm0, %v201_v8, %v200_v10  ;;  %v203_v13 = vld [vmem:[%s387_s0 + $0x29] sm:$0x4]   ;;  %v204_v14 = vld [vmem:[%s387_s0 + $0xa] ss:$16 sm:%s66_s4]   ;;  %v207_v19 = vld [vmem:[%s387_s0 + $0x27] sm:$0x4]  }
   0x7   :  { %v205_v15 = vld [vmem:[%s387_s0 + $0x28] sm:$0x4]   ;;  %v60_v16 = vsel %vm6_vm0, %v203_v13, %v202_v12  ;;  %v206_v18 = vld [vmem:[%s387_s0 + $0x9] ss:$16 sm:%s77_s9]   ;;  %v209_v21 = vld [vmem:[%s387_s0 + $0x26] sm:$0x4]  }
   0x8   :  { %28 = vrot.lane.b32.xlu0 %v27_v9, %s243_s10  ;;  %50 = vrot.lane.b32.xlu1 %v49_v11, %s244_s12  ;;  %v71_v17 = vsel %vm6_vm0, %v205_v15, %v204_v14  ;;  %v208_v20 = vld [vmem:[%s387_s0 + $0x8] ss:$16 sm:%s88_s11]   ;;  %s99_s21 = smov 3  ;;  %s245_s22 = smov 88   ;;  %v82_v22 = vsel %vm6_vm0, %v207_v19, %v206_v18  ;;  %vm63_vm6 = vcmask 786112   ;;  %vm74_vm7 = vcmask 720512  }
   0x9   :  { %s110_s23 = smov 3  ;;  %s246_s24 = smov 80   ;;  %v93_v23 = vsel %vm6_vm0, %v209_v21, %v208_v20  ;;  %v210_v24 = vld [vmem:[%s387_s0 + $0x7] ss:$16 sm:%s99_s21]   ;;  %v213_v27 = vld [vmem:[%s387_s0 + $0x24] sm:$0x4]  }
   0xa   :  { %v211_v25 = vld [vmem:[%s387_s0 + $0x25] sm:$0x4]   ;;  %v212_v26 = vld [vmem:[%s387_s0 + $0x6] ss:$16 sm:%s110_s23]   ;;  %s121_s4 = smov 3  ;;  %s247_s5 = smov 72  }
   0xb   :  { %s132_s6 = smov 3  ;;  %s2_s7 = smov 3  ;;  %v193_v28 = vld [vmem:[%s387_s0 + $0x1e] sm:$0x4]   ;;  %v104_v29 = vsel %vm6_vm0, %v211_v25, %v210_v24  ;;  %v115_v31 = vsel %vm6_vm0, %v213_v27, %v212_v26  ;;  %v214_v32 = vld [vmem:[%s387_s0 + $0x5] ss:$16 sm:%s121_s4]  }
   0xc   :  { %61 = vrot.lane.b32.xlu0 %v60_v16, %s245_s22  ;;  %72 = vrot.lane.b32.xlu1 %v71_v17, %s246_s24  ;;  %s248_s10 = smov 64   ;;  %v3_v30 = vld [vmem:[%s387_s0] ss:$16 sm:%s2_s7]   ;;  %s143_s21 = smov 3  ;;  %vm85_vm8 = vcmask 654912   ;;  %vm96_vm9 = vcmask 589312  }
   0xd   :  { %v215_v33 = vld [vmem:[%s387_s0 + $0x23] sm:$0x4]   ;;  %v7_v34 = vsel %vm6_vm0, %v193_v28, %v3_v30  ;;  %v216_v35 = vld [vmem:[%s387_s0 + $0x4] ss:$16 sm:%s132_s6]   ;;  %s249_s22 = smov 56   ;;  %s154_s23 = smov 3 }
   0xe   :  { %v217_v36 = vld [vmem:[%s387_s0 + $0x22] sm:$0x4]   ;;  %9 = vst.msk [vmem:[#allocation0] ss:$8 sm:$0x7] %vm8_vm1, %v7_v34   ;;  %s250_s24 = smov 48   ;;  %v126_v37 = vsel %vm6_vm0, %v215_v33, %v214_v32 }
   0xf   :  { %v137_v38 = vsel %vm6_vm0, %v217_v36, %v216_v35  ;;  %v218_v39 = vld [vmem:[%s387_s0 + $0x3] ss:$16 sm:%s143_s21]   ;;  %v220_v41 = vld [vmem:[%s387_s0 + $0x2] ss:$16 sm:%s154_s23]   ;;  %s165_s4 = smov 3  ;;  %s252_s6 = smov 32  }
  0x10   :  { %83 = vrot.lane.b32.xlu0 %v82_v22, %s247_s5  ;;  %94 = vrot.lane.b32.xlu1 %v93_v23, %s248_s10  ;;  %v219_v40 = vld [vmem:[%s387_s0 + $0x21] sm:$0x4]   ;;  %v221_v42 = vld [vmem:[%s387_s0 + $0x20] sm:$0x4]   ;;  %s251_s5 = smov 40   ;;  %s254_s11 = smov 16  }
  0x11   :  { %v148_v43 = vsel %vm6_vm0, %v219_v40, %v218_v39  ;;  %v159_v44 = vsel %vm6_vm0, %v221_v42, %v220_v41  ;;  %v222_v45 = vld [vmem:[%s387_s0 + $0x1] ss:$16 sm:%s165_s4]   ;;  %s255_s12 = smov 8   ;;  %vm107_vm10 = vcmask 523712   ;;  %vm118_vm11 = vcmask 458112  }
  0x12   :  { %v223_v46 = vld [vmem:[%s387_s0 + $0x1f] sm:$0x4]   ;;  %s253_s0 = smov 24   ;;  %vm129_vm12 = vcmask 392512   ;;  %vm140_vm13 = vcmask 326912   ;;  %vm151_vm14 = vcmask 261312  }
  0x13   :  { %v170_v47 = vsel %vm6_vm0, %v223_v46, %v222_v45  ;;  %vm162_vm15 = vcmask 195712   ;;  %vm173_vm0 = vcmask 130112  }
  0x14   :  { %105 = vrot.lane.b32.xlu0 %v104_v29, %s249_s22  ;;  %116 = vrot.lane.b32.xlu1 %v115_v31, %s250_s24 }
  0x18   :  { %127 = vrot.lane.b32.xlu0 %v126_v37, %s251_s5  ;;  %138 = vrot.lane.b32.xlu1 %v137_v38, %s252_s6 }
  0x1c   :  { %149 = vrot.lane.b32.xlu0 %v148_v43, %s253_s0  ;;  %160 = vrot.lane.b32.xlu1 %v159_v44, %s254_s11 }
  0x20   :  { %171 = vrot.lane.b32.xlu0 %v170_v47, %s255_s12 }
  0x76   :  { %v18_v48 = vpop.permute.xlu0 %17   ;;  %v40_v49 = vpop.permute.xlu1 %39  }
  0x77   :  { %20 = vst.msk [vmem:[#allocation0] ss:$8 sm:$0x7] %vm19_vm2, %v18_v48  }
  0x7a   :  { %v29_v50 = vpop.permute.xlu0 %28   ;;  %v51_v51 = vpop.permute.xlu1 %50  }
  0x7b   :  { %31 = vst.msk [vmem:[#allocation0] ss:$8 sm:$0x7] %vm30_vm3, %v29_v50  }
  0x7c   :  { %42 = vst.msk [vmem:[#allocation0] ss:$8 sm:$0x7] %vm41_vm4, %v40_v49  }
  0x7d   :  { %53 = vst.msk [vmem:[#allocation0] ss:$8 sm:$0x7] %vm52_vm5, %v51_v51  }
  0x7e   :  { %v62_v52 = vpop.permute.xlu0 %61   ;;  %v73_v53 = vpop.permute.xlu1 %72  }
  0x7f   :  { %64 = vst.msk [vmem:[#allocation0] ss:$8 sm:$0x7] %vm63_vm6, %v62_v52  }
  0x80   :  { %75 = vst.msk [vmem:[#allocation0] ss:$8 sm:$0x7] %vm74_vm7, %v73_v53  }
  0x82   :  { %v84_v54 = vpop.permute.xlu0 %83   ;;  %v95_v55 = vpop.permute.xlu1 %94  }
  0x83   :  { %86 = vst.msk [vmem:[#allocation0] ss:$8 sm:$0x7] %vm85_vm8, %v84_v54  }
  0x84   :  { %97 = vst.msk [vmem:[#allocation0] ss:$8 sm:$0x7] %vm96_vm9, %v95_v55  }
  0x86   :  { %v106_v56 = vpop.permute.xlu0 %105   ;;  %v117_v57 = vpop.permute.xlu1 %116  }
  0x87   :  { %108 = vst.msk [vmem:[#allocation0] ss:$8 sm:$0x7] %vm107_vm10, %v106_v56  }
  0x88   :  { %119 = vst.msk [vmem:[#allocation0] ss:$8 sm:$0x7] %vm118_vm11, %v117_v57  }
  0x8a   :  { %v128_v58 = vpop.permute.xlu0 %127   ;;  %v139_v59 = vpop.permute.xlu1 %138  }
  0x8b   :  { %130 = vst.msk [vmem:[#allocation0] ss:$8 sm:$0x7] %vm129_vm12, %v128_v58  }
  0x8c   :  { %141 = vst.msk [vmem:[#allocation0] ss:$8 sm:$0x7] %vm140_vm13, %v139_v59  }
  0x8e   :  { %v150_v60 = vpop.permute.xlu0 %149   ;;  %v161_v61 = vpop.permute.xlu1 %160  }
  0x8f   :  { %152 = vst.msk [vmem:[#allocation0] ss:$8 sm:$0x7] %vm151_vm14, %v150_v60  }
  0x90   :  { %163 = vst.msk [vmem:[#allocation0] ss:$8 sm:$0x7] %vm162_vm15, %v161_v61  }
  0x92   :  { %v172_v62 = vpop.permute.xlu0 %171  }
  0x93   :  { %174 = vst.msk [vmem:[#allocation0] ss:$8 sm:$0x7] %vm173_vm0, %v172_v62  }
  0x9a   :  { %v178_v63 = vld [vmem:[#allocation0] sm:$0x1]  ;;  %v182_v0 = vld [vmem:[#allocation0 + $0x8] sm:$0x1]  ;;  %v187_v1 = vld [vmem:[#allocation0 + $0x10] sm:$0x1] }
  0x9b   :  { %180 = vst [vmem:[%s388_s1] sm:$0x1] %v178_v63  ;;  %224 = vst [vmem:[%s388_s1 + $0x1] sm:$0x1] %v182_v0 }
  0x9c   :  { %225 = vst [vmem:[%s388_s1 + $0x2] sm:$0x1] %v187_v1 }

// kernel: tile.28
= control target key start
LH: loop header
LB: loop body
LE: loop exit
PB: predicated region body
PF: predicated region fallthrough
CT: control target
= control target key end

     0   :  { %s34_s0 = inlined_call_operand.vmem [shape: f32[16], index: 0, kind: input, shape index: {}]   ;;  %s35_s1 = inlined_call_operand.vmem [shape: f32[18,16], index: 1, kind: output, shape index: {}]  }
   0x1   :  { %v4_v0 = vld [vmem:[%s34_s0] ss:$0 sm:$0xff] }
   0x2   :  { %5 = vst [vmem:[%s35_s1] sm:$0xff] %v4_v0  ;;  %10 = vst [vmem:[%s35_s1 + $0x8] sm:$0xff] %v4_v0 }
   0x3   :  { %11 = vst [vmem:[%s35_s1 + $0x10] sm:$0xff] %v4_v0 }

// kernel: tile.29
= control target key start
LH: loop header
LB: loop body
LE: loop exit
PB: predicated region body
PF: predicated region fallthrough
CT: control target
= control target key end

     0   :  { %s6_s6 = smov 3  ;;  %s20_s9 = smov 3  ;;  %vm3_vm0 = vcmask 130048   ;;  %vm10_vm1 = vcmask 1048448   ;;  %vm17_vm2 = vcmask 917248   ;;  %vm24_vm3 = vcmask 786048   ;;  %s137_s0 = inlined_call_operand.vmem [shape: f32[18,16], index: 0, kind: input, shape index: {}]   ;;  %s138_s1 = inlined_call_operand.vmem [shape: f32[1,288], index: 1, kind: output, shape index: {}]  }
   0x1   :  { %v71_v0 = vld [vmem:[%s137_s0 + $0x7] ss:$8 sm:%s6_s6]   ;;  %s87_s10 = smov 112   ;;  %v73_v1 = vld [vmem:[%s137_s0 + $0x5] ss:$8 sm:%s20_s9]   ;;  %s13_s13 = smov 3 }
   0x2   :  { %8 = vrot.lane.b32.xlu0 %v71_v0, %s87_s10  ;;  %s88_s14 = smov 80   ;;  %v72_v2 = vld [vmem:[%s137_s0 + $0x6] ss:$8 sm:%s13_s13]   ;;  %s27_s17 = smov 3  ;;  %vm31_vm4 = vcmask 654848   ;;  %vm38_vm5 = vcmask 523648  }
   0x3   :  { %22 = vrot.lane.b32.xlu1 %v73_v1, %s88_s14  ;;  %v74_v3 = vld [vmem:[%s137_s0 + $0x4] ss:$8 sm:%s27_s17]   ;;  %s34_s20 = smov 3  ;;  %s41_s21 = smov 3  ;;  %vm45_vm6 = vcmask 392448   ;;  %vm51_vm7 = vcmask 261248  }
   0x4   :  { %s89_s22 = smov 96   ;;  %v2_v4 = vld [vmem:[%s137_s0] ss:$8 sm:$0x7]   ;;  %s90_s25 = smov 64  }
   0x5   :  { %v75_v5 = vld [vmem:[%s137_s0 + $0x3] ss:$8 sm:%s34_s20]   ;;  %4 = vst.msk [vmem:[#allocation0] ss:$8 sm:$0x7] %vm3_vm0, %v2_v4   ;;  %s91_s30 = smov 48  }
   0x6   :  { %15 = vrot.lane.b32.xlu0 %v72_v2, %s89_s22  ;;  %v76_v6 = vld [vmem:[%s137_s0 + $0x2] ss:$8 sm:%s41_s21]   ;;  %s92_s2 = smov 32   ;;  %v77_v7 = vld [vmem:[%s137_s0 + $0x1] ss:$8 sm:$0x7]  }
   0x7   :  { %29 = vrot.lane.b32.xlu1 %v74_v3, %s90_s25  ;;  %s93_s0 = smov 16  }
   0xa   :  { %36 = vrot.lane.b32.xlu0 %v75_v5, %s91_s30 }
   0xb   :  { %43 = vrot.lane.b32.xlu1 %v76_v6, %s92_s2 }
   0xe   :  { %49 = vrot.lane.b32.xlu0 %v77_v7, %s93_s0 }
  0x74   :  { %v9_v8 = vpop.permute.xlu0 %8  }
  0x75   :  { %11 = vst.msk [vmem:[#allocation0] ss:$8 sm:$0x3] %vm10_vm1, %v9_v8   ;;  %v23_v9 = vpop.permute.xlu1 %22  }
  0x78   :  { %v16_v10 = vpop.permute.xlu0 %15  }
  0x79   :  { %18 = vst.msk [vmem:[#allocation0] ss:$8 sm:$0x3] %vm17_vm2, %v16_v10   ;;  %v30_v11 = vpop.permute.xlu1 %29  }
  0x7a   :  { %25 = vst.msk [vmem:[#allocation0] ss:$8 sm:$0x3] %vm24_vm3, %v23_v9  }
  0x7b   :  { %32 = vst.msk [vmem:[#allocation0] ss:$8 sm:$0x3] %vm31_vm4, %v30_v11  }
  0x7c   :  { %v37_v12 = vpop.permute.xlu0 %36  }
  0x7d   :  { %39 = vst.msk [vmem:[#allocation0] ss:$8 sm:$0x3] %vm38_vm5, %v37_v12   ;;  %v44_v13 = vpop.permute.xlu1 %43  }
  0x7e   :  { %46 = vst.msk [vmem:[#allocation0] ss:$8 sm:$0x3] %vm45_vm6, %v44_v13  }
  0x80   :  { %v50_v14 = vpop.permute.xlu0 %49  }
  0x81   :  { %52 = vst.msk [vmem:[#allocation0] ss:$8 sm:$0x7] %vm51_vm7, %v50_v14  }
  0x88   :  { %v56_v15 = vld [vmem:[#allocation0] sm:$0x1]  ;;  %v60_v16 = vld [vmem:[#allocation0 + $0x8] sm:$0x1]  ;;  %v65_v17 = vld [vmem:[#allocation0 + $0x10] sm:$0x1] }
  0x89   :  { %58 = vst [vmem:[%s138_s1] sm:$0x1] %v56_v15  ;;  %78 = vst [vmem:[%s138_s1 + $0x1] sm:$0x1] %v60_v16 }
  0x8a   :  { %79 = vst [vmem:[%s138_s1 + $0x2] sm:$0x1] %v65_v17 }

// kernel: damage_conv3d_forward.3
= control target key start
LH: loop header
LB: loop body
LE: loop exit
PB: predicated region body
PF: predicated region fallthrough
CT: control target
= control target key end

     0   :  { %s822_s26 = smov 0   ;;  %s976_s0 = inlined_call_operand.vmem [shape: f32[48,288], index: 0, kind: input, shape index: {}]   ;;  %s977_s1 = inlined_call_operand.vmem [shape: f32[1,288], index: 1, kind: input, shape index: {}]   ;;  %s978_s2 = inlined_call_operand.vmem [shape: f32[1,288], index: 2, kind: input, shape index: {}]   ;;  %s979_s3 = inlined_call_operand.vmem [shape: f32[288,16], index: 3, kind: input, shape index: {}]   ;;  %s980_s4 = inlined_call_operand.vmem [shape: f32[1,16], index: 4, kind: input, shape index: {}]   ;;  %s981_s5 = inlined_call_operand.vmem [shape: f32[1,16], index: 5, kind: input, shape index: {}]   ;;  %s982_s6 = inlined_call_operand.<no memory space> [shape: f32[1,1], index: 6, kind: input, shape index: {}]   ;;  %s983_s7 = inlined_call_operand.vmem [shape: f32[48,1], index: 7, kind: output, shape index: {}]  }
   0x1   :  { %v12_v0 = vstv %s982_s6 }
   0x2   :  { %13 = vst [vmem:[#allocation2] sm:$0x1] %v12_v0 }
   0x3 LB: > { %s641_s27 = sadd.s32 4294967295, %s777_s26   ;;  %p645_p0 = scmp.ge.s32.totalorder %s777_s26, 1  ;;  %s777_s26 = sphi %s822_s26, %s19_s26  }
   0x4   : > { %p241_p1 = scmp.lt.s32.totalorder %s777_s26, 4 }
   0x6   : > { %p242_p2 = pnand %p645_p0, %p241_p1 }
   0x7   : > { %v355_v1 = vld [vmem:[%s979_s3 + $0x80] sm:$0xff] (!%p242_p2)  ;;  %v356_v2 = vld [vmem:[%s979_s3 + $0x88] sm:$0xff] (!%p242_p2)  ;;  %s646_s10 = sshll.u32 (!%p242_p2), %s641_s27, 1  ;;  %v295_v4 = vlaneseq (!%p242_p2)  ;;  %v357_v7 = vld [vmem:[%s979_s3 + $0x90] sm:$0xff] (!%p242_p2)  ;;  %vm382_vm0 = vcmask (!%p242_p2), 261120   ;;  %vm554_vm2 = vcmask (!%p242_p2), 130048  }
   0x8   : > { %245 = sbr.rel (%p242_p2) target bundleno = 442 (0x1ba), region = 48  ;;  %v339_v3 = vld [vmem:[%s979_s3] sm:$0xff] (!%p242_p2)  ;;  %v714_v5 = vpack.c.bf16 (!%p242_p2), %v356_v2, %v355_v1  ;;  %v340_v6 = vld [vmem:[%s979_s3 + $0x8] sm:$0xff] (!%p242_p2)  ;;  %v358_v8 = vld [vmem:[%s979_s3 + $0x98] sm:$0xff] (!%p242_p2)  ;;  %p275_p3 = scmp.lt.s32.totalorder (!%p242_p2), %s646_s10, 5  ;;  %vm582_vm4 = vcmask (!%p242_p2), 7168  }
   0x9   : > { %v716_v9 = vpack.c.bf16 (!%p242_p2), %v340_v6, %v339_v3  ;;  %v718_v10 = vpack.c.bf16 (!%p242_p2), %v358_v8, %v357_v7  ;;  %v341_v11 = vld [vmem:[%s979_s3 + $0x10] sm:$0xff] (!%p242_p2)  ;;  %v342_v12 = vld [vmem:[%s979_s3 + $0x18] sm:$0xff] (!%p242_p2)  ;;  %v359_v13 = vld [vmem:[%s979_s3 + $0xa0] sm:$0xff] (!%p242_p2)  ;;  %v862_v16 = vshrl.u32 (!%p242_p2), %v295_v4, 7 }
   0xa   : > { %715 = vmatprep.subr.bf16.mxu0 (!%p242_p2), %v714_v5  ;;  %v360_v14 = vld [vmem:[%s979_s3 + $0xa8] sm:$0xff] (!%p242_p2)  ;;  %v720_v15 = vpack.c.bf16 (!%p242_p2), %v342_v12, %v341_v11  ;;  %v343_v18 = vld [vmem:[%s979_s3 + $0x20] sm:$0xff] (!%p242_p2)  ;;  %v361_v20 = vld [vmem:[%s979_s3 + $0xb0] sm:$0xff] (!%p242_p2) }
   0xb   : > { %717 = vmatpush3.bf16.msra.mxu0 (!%p242_p2), %v716_v9  ;;  %v722_v17 = vpack.c.bf16 (!%p242_p2), %v360_v14, %v359_v13  ;;  %v344_v19 = vld [vmem:[%s979_s3 + $0x28] sm:$0xff] (!%p242_p2)  ;;  %v362_v21 = vld [vmem:[%s979_s3 + $0xb8] sm:$0xff] (!%p242_p2)  ;;  %v345_v23 = vld [vmem:[%s979_s3 + $0x30] sm:$0xff] (!%p242_p2)  ;;  %v301_v24 = vsub.s32 (!%p242_p2), 1, %v862_v16  ;;  %v305_v32 = vsub.s32 (!%p242_p2), 2, %v862_v16  ;;  %v297_v63 = vsub.s32 (!%p242_p2), 0, %v862_v16 }
   0xc   : > { %719 = vmatprep.subr.bf16.mxu0 (!%p242_p2), %v718_v10  ;;  %v724_v22 = vpack.c.bf16 (!%p242_p2), %v344_v19, %v343_v18  ;;  %v726_v25 = vpack.c.bf16 (!%p242_p2), %v362_v21, %v361_v20  ;;  %v346_v26 = vld [vmem:[%s979_s3 + $0x38] sm:$0xff] (!%p242_p2)  ;;  %v371_v27 = vld [vmem:[%s979_s3 + $0x100] sm:$0xff] (!%p242_p2)  ;;  %v372_v28 = vld [vmem:[%s979_s3 + $0x108] sm:$0xff] (!%p242_p2) }
   0xd   : > { %v363_v29 = vld [vmem:[%s979_s3 + $0xc0] sm:$0xff] (!%p242_p2)  ;;  %v364_v30 = vld [vmem:[%s979_s3 + $0xc8] sm:$0xff] (!%p242_p2)  ;;  %v746_v31 = vpack.c.bf16 (!%p242_p2), %v372_v28, %v371_v27  ;;  %v728_v36 = vpack.c.bf16 (!%p242_p2), %v346_v26, %v345_v23  ;;  %v373_v39 = vld [vmem:[%s979_s3 + $0x110] sm:$0xff] (!%p242_p2) }
   0xe   : > { %v347_v33 = vld [vmem:[%s979_s3 + $0x40] sm:$0xff] (!%p242_p2)  ;;  %v374_v40 = vld [vmem:[%s979_s3 + $0x118] sm:$0xff] (!%p242_p2)  ;;  %v730_v41 = vpack.c.bf16 (!%p242_p2), %v364_v30, %v363_v29  ;;  %v348_v42 = vld [vmem:[%s979_s3 + $0x48] sm:$0xff] (!%p242_p2) }
   0xf   : > { %s985_s10 = smov (!%p275_p3, %s646_s10), 5  ;;  %721 = vmatpush3.bf16.msra.mxu0 %v720_v15  ;;  %v293_v35 = vld [vmem:[%s977_s1] sm:$0x7]  ;;  %747 = vmatprep.subr.bf16.mxu1 %v746_v31  ;;  %v750_v44 = vpack.c.bf16 %v374_v40, %v373_v39  ;;  %v365_v47 = vld [vmem:[%s979_s3 + $0xd0] sm:$0xff]  ;;  %v366_v48 = vld [vmem:[%s979_s3 + $0xd8] sm:$0xff]  ;;  %v732_v52 = vpack.c.bf16 %v348_v42, %v347_v33 }
  0x10   : > { %s754_s6 = smul.u32 24, %s985_s10  ;;  %723 = vmatprep.subr.bf16.mxu0 %v722_v17  ;;  %v302_v37 = vrot.slane %v293_v35, %v301_v24  ;;  %v316_v38 = vld [vmem:[%s978_s2] sm:$0x7]  ;;  %749 = vmatpush3.bf16.msra.mxu1 %v746_v31  ;;  %v306_v50 = vrot.slane %v293_v35, %v305_v32  ;;  %v734_v56 = vpack.c.bf16 %v366_v48, %v365_v47  ;;  %v349_v57 = vld [vmem:[%s979_s3 + $0x50] sm:$0xff]  ;;  %v350_v58 = vld [vmem:[%s979_s3 + $0x58] sm:$0xff]  ;;  %s649_s24 = sshll.u32 %s985_s10, 3 }
  0x11   : > { %v325_v43 = vrot.slane %v316_v38, %v301_v24  ;;  %v329_v51 = vrot.slane %v316_v38, %v305_v32  ;;  %751 = vmatprep.subr.bf16.mxu1 %v750_v44  ;;  %v367_v59 = vld [vmem:[%s979_s3 + $0xe0] sm:$0xff]  ;;  %v368_v60 = vld [vmem:[%s979_s3 + $0xe8] sm:$0xff]  ;;  %v736_v0 = vpack.c.bf16 %v350_v58, %v349_v57  ;;  %v369_v4 = vld [vmem:[%s979_s3 + $0xf0] sm:$0xff]  ;;  %v298_v6 = vrot.slane %v293_v35, %v297_v63  ;;  %s285_s28 = scalar_lea.vmem %s983_s7, %s649_s24 }
  0x12   : > { %s883_s16 = scalar_lea.vmem %s976_s0, %s754_s6  ;;  %v738_v1 = vpack.c.bf16 %v368_v60, %v367_v59  ;;  %v351_v2 = vld [vmem:[%s979_s3 + $0x60] sm:$0xff]  ;;  %v352_v3 = vld [vmem:[%s979_s3 + $0x68] sm:$0xff]  ;;  %v370_v5 = vld [vmem:[%s979_s3 + $0xf8] sm:$0xff]  ;;  %v321_v14 = vrot.slane %v316_v38, %v297_v63 }
  0x13   : > { %v288_v34 = vld [vmem:[%s883_s16 + $0x8] sm:$0xff]  ;;  %725 = vmatpush3.bf16.msra.mxu0 %v724_v22  ;;  %v289_v45 = vld [vmem:[%s883_s16 + $0x10] sm:$0xff]  ;;  %v740_v7 = vpack.c.bf16 %v352_v3, %v351_v2  ;;  %v287_v8 = vld [vmem:[%s883_s16] sm:$0xff]  ;;  %v742_v9 = vpack.c.bf16 %v370_v5, %v369_v4 }
  0x14   : > { %727 = vmatprep.subr.bf16.mxu0 %v726_v25  ;;  %v292_v46 = vld [vmem:[%s883_s16 + $0x28] sm:$0xff]  ;;  %v311_v49 = vmul.f32 %v302_v37, %v288_v34  ;;  %v312_v54 = vmul.f32 %v306_v50, %v289_v45  ;;  %753 = vmatpush3.bf16.msra.mxu1 %v750_v44  ;;  %v353_v10 = vld [vmem:[%s979_s3 + $0x70] sm:$0xff]  ;;  %v354_v11 = vld [vmem:[%s979_s3 + $0x78] sm:$0xff]  ;;  %v310_v13 = vmul.f32 %v298_v6, %v287_v8 }
  0x15   : > { %v315_v55 = vmul.f32 %v306_v50, %v292_v46  ;;  %v291_v12 = vld [vmem:[%s883_s16 + $0x20] sm:$0xff]  ;;  %v744_v15 = vpack.c.bf16 %v354_v11, %v353_v10  ;;  %v290_v17 = vld [vmem:[%s883_s16 + $0x18] sm:$0xff] }
  0x16   : > { %v334_v53 = vadd.f32 %v325_v43, %v311_v49  ;;  %v335_v61 = vadd.f32 %v329_v51, %v312_v54  ;;  %v314_v16 = vmul.f32 %v302_v37, %v291_v12  ;;  %v333_v18 = vadd.f32 %v321_v14, %v310_v13  ;;  %v650_v26 = vld [vmem:[%s980_s4] ss:$0 sm:$0xff] }
  0x17   : > { %729 = vmatpush3.bf16.msra.mxu0 %v728_v36  ;;  %v338_v62 = vadd.f32 %v329_v51, %v315_v55  ;;  %v313_v19 = vmul.f32 %v298_v6, %v290_v17  ;;  %v653_v35 = vld [vmem:[%s981_s5] ss:$0 sm:$0xff] }
  0x18   : > { %731 = vmatprep.subr.bf16.mxu0 %v730_v41  ;;  %453 = vmatprep.mubr.f32.mxu0 %v334_v53  ;;  %v337_v20 = vadd.f32 %v325_v43, %v314_v16  ;;  %v654_v44 = vld [vmem:[#allocation2] ss:$0 sm:$0xff] }
  0x19   : > { %711 = vmatprep.mubr.msk.f32.mxu1 %vm382_vm0, %v335_v61  ;;  %v336_v21 = vadd.f32 %v321_v14, %v313_v19 }
  0x1a   : > { %712 = vmatmul.mubr.msk.f32.vlgmr.msra.gmra.mrb[0].mxu1 %vm382_vm0, %v338_v62 }
  0x1b   : > { %733 = vmatpush3.bf16.msra.mxu0 %v732_v52 }
  0x1c   : > { %735 = vmatprep.subr.bf16.mxu0 %v734_v56 }
  0x1f   : > { %737 = vmatpush3.bf16.msra.mxu0 %v736_v0 }
  0x20   : > { %739 = vmatprep.subr.bf16.mxu0 %v738_v1 }
  0x23   : > { %741 = vmatpush3.bf16.msra.mxu0 %v740_v7 }
  0x24   : > { %743 = vmatprep.subr.bf16.mxu0 %v742_v9 }
  0x27   : > { %745 = vmatpush3.bf16.msra.mxu0 %v744_v15 }
  0x2a   : > { %454 = vmatmul.mubr.f32.vlgmr.msra.gmra.mrb[0].mxu0 %v333_v18 }
  0x2b   : > { %458 = vmatprep.mubr.f32.mxu0 %v337_v20 }
  0x2e   : > { %459 = vmatmul.mubr.f32.gmra.mrb[2].mxu0 %v336_v21 }
  0xed   : > { %v713_v22 = vpop.f32.mrb[0].mxu1 }
  0xee   : > { %v530_v23 = vpop.f32.mrb[1].mxu1 }
  0xfd   : > { %v691_v24 = vpop.f32.mrb[0].mxu0 }
  0xfe   : > { %v692_v25 = vpop.f32.mrb[1].mxu0 }
  0xff   : > { %v693_v27 = vadd.f32 %v692_v25, %v691_v24 }
 0x101   : > { %v694_v28 = vpop.f32.mrb[2].mxu0  ;;  %v456_v29 = vadd.f32 %v693_v27, %v650_v26 }
 0x102   : > { %v695_v30 = vpop.f32.mrb[3].mxu0 }
 0x103   : > { %v531_v31 = vadd.f32 %v530_v23, %v456_v29  ;;  %v696_v32 = vadd.f32 %v695_v30, %v694_v28 }
 0x105   : > { %v541_v33 = vmul.f32 0.01, %v531_v31  ;;  %v461_v34 = vadd.f32 %v696_v32, %v650_v26  ;;  %vm539_vm1 = vcmp.gt.f32.partialorder %v531_v31, 0.0 }
 0x107   : > { %v536_v36 = vadd.f32 %v713_v22, %v461_v34  ;;  %v543_v37 = vsel %vm539_vm1, %v531_v31, %v541_v33 }
 0x108   : > { %v552_v38 = vmul.f32 %v653_v35, %v543_v37 }
 0x109   : > { %vm540_vm3 = vcmp.gt.f32.partialorder %v536_v36, 0.0  ;;  %v542_v39 = vmul.f32 0.01, %v536_v36 }
 0x10a   : > { %v555_v40 = vsel %vm554_vm2, %v552_v38, 0.0 }
 0x10b   : > { %556 = vadd.xlane.f32.xlu0 %v555_v40  ;;  %v544_v41 = vsel %vm540_vm3, %v536_v36, %v542_v39 }
 0x10c   : > { %v553_v42 = vmul.f32 %v653_v35, %v544_v41 }
 0x10e   : > { %v558_v43 = vsel %vm554_vm2, %v553_v42, 0.0 }
 0x10f   : > { %559 = vadd.xlane.f32.xlu0 %v558_v43 }
 0x198   : > { %v557_v45 = vpop.xlane.xlu0 %556 }
 0x199   : > { %v568_v46 = vadd.f32 %v654_v44, %v557_v45 }
 0x19b   : > { %v655_v47 = vmul.f32 -1.442695, %v568_v46 }
 0x19c   : > { %v560_v48 = vpop.xlane.xlu0 %559 }
 0x19d   : > { %763 = vpow2.f32 %v655_v47  ;;  %v569_v49 = vadd.f32 %v654_v44, %v560_v48 }
 0x19f   : > { %v656_v50 = vmul.f32 -1.442695, %v569_v49 }
 0x1a1   : > { %765 = vpow2.f32 %v656_v50 }
 0x1a7   : > { %v764_v51 = vpop.eup %763 }
 0x1a8   : > { %v576_v52 = vadd.f32 1.0, %v764_v51 }
 0x1aa   : > { %767 = vrcp.f32 %v576_v52 }
 0x1ab   : > { %v766_v53 = vpop.eup %765 }
 0x1ac   : > { %v577_v54 = vadd.f32 1.0, %v766_v53 }
 0x1ae   : > { %769 = vrcp.f32 %v577_v54 }
 0x1b4   : > { %v768_v55 = vpop.eup %767 }
 0x1b5   : > { %583 = vst.msk [vmem:[%s285_s28] sm:$0xff] %vm582_vm4, %v768_v55 }
 0x1b8   : > { %v770_v56 = vpop.eup %769 }
 0x1b9   : > { %584 = vst.msk [vmem:[%s285_s28 + $0x8] sm:$0xff] %vm582_vm4, %v770_v56 }
 0x1ba PF: > { %s19_s26 = sadd.s32 1, %s777_s26  }
 0x1bb   : > { %p16_p4 = scmp.ge.s32.totalorder %s19_s26, 5  }
 0x1bd   :  { %18 = sbr.rel (!%p16_p4) target bundleno = 3 (0x3), region = 78 }

// kernel: damage_conv3d_forward.2
= control target key start
LH: loop header
LB: loop body
LE: loop exit
PB: predicated region body
PF: predicated region fallthrough
CT: control target
= control target key end

     0   :  { %s1667_s21 = smov 0   ;;  %s2346_s0 = inlined_call_operand.vmem [shape: f32[48,128], index: 0, kind: input, shape index: {}]   ;;  %s2347_s1 = inlined_call_operand.vmem [shape: f32[128,384], index: 1, kind: input, shape index: {}]   ;;  %s2348_s2 = inlined_call_operand.vmem [shape: f32[1,384], index: 2, kind: input, shape index: {}]   ;;  %s2349_s3 = inlined_call_operand.vmem [shape: f32[384,288], index: 3, kind: input, shape index: {}]   ;;  %s2350_s4 = inlined_call_operand.vmem [shape: f32[1,288], index: 4, kind: input, shape index: {}]   ;;  %s2351_s5 = inlined_call_operand.vmem [shape: f32[48,288], index: 5, kind: output, shape index: {0}]   ;;  %s2352_s6 = inlined_call_operand.vmem [shape: f32[3,2,288], index: 6, kind: output, shape index: {1}]  }
   0x1 LB: > { %s1673_s22 = sadd.s32 4294967295, %s1628_s21   ;;  %p1224_p0 = scmp.ge.s32.totalorder %s1628_s21, 1  ;;  %s1628_s21 = sphi %s1667_s21, %s17_s21  }
   0x2   : > { %p216_p1 = scmp.lt.s32.totalorder %s1628_s21, 4 }
   0x4   : > { %p217_p2 = pnand %p1224_p0, %p216_p1 }
   0x5   : > { %v273_v0 = vld [vmem:[%s2347_s1 + $0x8] sm:$0xff] (!%p217_p2)  ;;  %v276_v1 = vld [vmem:[%s2347_s1 + $0x20] sm:$0xff] (!%p217_p2)  ;;  %v275_v4 = vld [vmem:[%s2347_s1 + $0x18] sm:$0xff] (!%p217_p2)  ;;  %v1630_v7 = vmov (!%p217_p2), 0.0   ;;  %s1225_s27 = sshll.u32 (!%p217_p2), %s1673_s22, 1  ;;  %vm992_vm6 = vcmask (!%p217_p2), 261120  }
   0x6   : > { %220 = sbr.rel (%p217_p2) target bundleno = 543 (0x21f), region = 40  ;;  %v272_v2 = vld [vmem:[%s2347_s1] sm:$0xff] (!%p217_p2)  ;;  %v1378_v3 = vpack.c.bf16 (!%p217_p2), %v276_v1, %v273_v0  ;;  %v279_v5 = vld [vmem:[%s2347_s1 + $0x38] sm:$0xff] (!%p217_p2)  ;;  %v282_v6 = vld [vmem:[%s2347_s1 + $0x50] sm:$0xff] (!%p217_p2)  ;;  %401 = vmatprep.mubr.f32.mxu1 (!%p217_p2), %v1630_v7  ;;  %p1771_p3 = scmp.lt.s32.totalorder (!%p217_p2), %s1225_s27, 5 }
   0x7   : > { %v1380_v8 = vpack.c.bf16 (!%p217_p2), %v275_v4, %v272_v2  ;;  %v1382_v9 = vpack.c.bf16 (!%p217_p2), %v282_v6, %v279_v5  ;;  %v278_v10 = vld [vmem:[%s2347_s1 + $0x30] sm:$0xff] (!%p217_p2)  ;;  %v281_v11 = vld [vmem:[%s2347_s1 + $0x48] sm:$0xff] (!%p217_p2)  ;;  %v288_v13 = vld [vmem:[%s2347_s1 + $0x80] sm:$0xff] (!%p217_p2)  ;;  %p265_p4 = scmp.lt.s32.totalorder (!%p217_p2), %s1673_s22, 2 }
   0x8   : > { %v285_v12 = vld [vmem:[%s2347_s1 + $0x68] sm:$0xff] (!%p217_p2)  ;;  %1379 = vmatprep.subr.bf16.mxu1 (!%p217_p2), %v1378_v3  ;;  %v1384_v14 = vpack.c.bf16 (!%p217_p2), %v281_v11, %v278_v10  ;;  %v284_v16 = vld [vmem:[%s2347_s1 + $0x60] sm:$0xff] (!%p217_p2)  ;;  %v287_v17 = vld [vmem:[%s2347_s1 + $0x78] sm:$0xff] (!%p217_p2) }
   0x9   : > { %1381 = vmatpush1.bf16.msra.mxu1 (!%p217_p2), %v1380_v8  ;;  %v1386_v15 = vpack.c.bf16 (!%p217_p2), %v288_v13, %v285_v12  ;;  %v291_v18 = vld [vmem:[%s2347_s1 + $0x98] sm:$0xff] (!%p217_p2)  ;;  %v294_v19 = vld [vmem:[%s2347_s1 + $0xb0] sm:$0xff] (!%p217_p2)  ;;  %v1388_v20 = vpack.c.bf16 (!%p217_p2), %v287_v17, %v284_v16  ;;  %v293_v23 = vld [vmem:[%s2347_s1 + $0xa8] sm:$0xff] (!%p217_p2) }
   0xa   : > { %1383 = vmatprep.subr.bf16.mxu1 (!%p217_p2), %v1382_v9  ;;  %v1390_v21 = vpack.c.bf16 (!%p217_p2), %v294_v19, %v291_v18  ;;  %v290_v22 = vld [vmem:[%s2347_s1 + $0x90] sm:$0xff] (!%p217_p2)  ;;  %v297_v24 = vld [vmem:[%s2347_s1 + $0xc8] sm:$0xff] (!%p217_p2)  ;;  %v300_v25 = vld [vmem:[%s2347_s1 + $0xe0] sm:$0xff] (!%p217_p2) }
   0xb   : > { %v1392_v26 = vpack.c.bf16 (!%p217_p2), %v293_v23, %v290_v22  ;;  %v1394_v27 = vpack.c.bf16 (!%p217_p2), %v300_v25, %v297_v24  ;;  %v296_v28 = vld [vmem:[%s2347_s1 + $0xc0] sm:$0xff] (!%p217_p2)  ;;  %v299_v29 = vld [vmem:[%s2347_s1 + $0xd8] sm:$0xff] (!%p217_p2)  ;;  %v306_v31 = vld [vmem:[%s2347_s1 + $0x110] sm:$0xff] (!%p217_p2) }
   0xc   : > { %v303_v30 = vld [vmem:[%s2347_s1 + $0xf8] sm:$0xff] (!%p217_p2)  ;;  %v302_v32 = vld [vmem:[%s2347_s1 + $0xf0] sm:$0xff] (!%p217_p2)  ;;  %v305_v33 = vld [vmem:[%s2347_s1 + $0x108] sm:$0xff] (!%p217_p2)  ;;  %v1396_v34 = vpack.c.bf16 (!%p217_p2), %v299_v29, %v296_v28 }
   0xd   : > { %1385 = vmatpush1.bf16.msra.mxu1 %v1384_v14  ;;  %v309_v35 = vld [vmem:[%s2347_s1 + $0x128] sm:$0xff]  ;;  %v312_v36 = vld [vmem:[%s2347_s1 + $0x140] sm:$0xff]  ;;  %v1398_v38 = vpack.c.bf16 %v306_v31, %v303_v30  ;;  %v510_v41 = vld [vmem:[%s2349_s3 + $0x18] sm:$0xff]  ;;  %v1400_v51 = vpack.c.bf16 %v305_v33, %v302_v32  ;;  %s2355_s27 = smov (!%p1771_p3, %s1225_s27), 5 }
   0xe   : > { %1387 = vmatprep.subr.bf16.mxu1 %v1386_v15  ;;  %v508_v37 = vld [vmem:[%s2349_s3 + $0x8] sm:$0xff]  ;;  %v511_v39 = vld [vmem:[%s2349_s3 + $0x20] sm:$0xff]  ;;  %v514_v44 = vld [vmem:[%s2349_s3 + $0x38] sm:$0xff]  ;;  %v1402_v52 = vpack.c.bf16 %v312_v36, %v309_v35  ;;  %s1226_s9 = sshll.u32 %s2355_s27, 3  ;;  %s1610_s14 = smul.u32 24, %s2355_s27 }
   0xf   : > { %v507_v40 = vld [vmem:[%s2349_s3] sm:$0xff]  ;;  %v1442_v42 = vpack.c.bf16 %v511_v39, %v508_v37  ;;  %v517_v45 = vld [vmem:[%s2349_s3 + $0x50] sm:$0xff]  ;;  %v516_v48 = vld [vmem:[%s2349_s3 + $0x48] sm:$0xff]  ;;  %s256_s25 = scalar_lea.vmem %s2346_s0, %s1226_s9 }
  0x10   : > { %v1444_v43 = vpack.c.bf16 %v510_v41, %v507_v40  ;;  %v513_v46 = vld [vmem:[%s2349_s3 + $0x30] sm:$0xff]  ;;  %v1446_v47 = vpack.c.bf16 %v517_v45, %v514_v44  ;;  %v520_v49 = vld [vmem:[%s2349_s3 + $0x68] sm:$0xff]  ;;  %v523_v50 = vld [vmem:[%s2349_s3 + $0x80] sm:$0xff]  ;;  %s2313_s18 = scalar_lea.vmem %s2351_s5, %s1610_s14 }
  0x11   : > { %1389 = vmatpush1.bf16.msra.mxu1 %v1388_v20  ;;  %1443 = vmatprep.subr.bf16.mxu0 %v1442_v42  ;;  %v308_v53 = vld [vmem:[%s2347_s1 + $0x120] sm:$0xff]  ;;  %v311_v54 = vld [vmem:[%s2347_s1 + $0x138] sm:$0xff]  ;;  %v1448_v56 = vpack.c.bf16 %v516_v48, %v513_v46  ;;  %v318_v57 = vld [vmem:[%s2347_s1 + $0x170] sm:$0xff]  ;;  %v1450_v58 = vpack.c.bf16 %v523_v50, %v520_v49 }
  0x12   : > { %1391 = vmatprep.subr.bf16.mxu1 %v1390_v21  ;;  %v315_v55 = vld [vmem:[%s2347_s1 + $0x158] sm:$0xff]  ;;  %1445 = vmatpush1.bf16.msra.mxu0 %v1444_v43  ;;  %v519_v59 = vld [vmem:[%s2349_s3 + $0x60] sm:$0xff]  ;;  %v529_v62 = vld [vmem:[%s2349_s3 + $0xb0] sm:$0xff]  ;;  %v1404_v63 = vpack.c.bf16 %v311_v54, %v308_v53 }
  0x13   : > { %1447 = vmatprep.subr.bf16.mxu0 %v1446_v47  ;;  %v522_v60 = vld [vmem:[%s2349_s3 + $0x78] sm:$0xff]  ;;  %v1406_v0 = vpack.c.bf16 %v318_v57, %v315_v55  ;;  %v314_v1 = vld [vmem:[%s2347_s1 + $0x150] sm:$0xff]  ;;  %v317_v2 = vld [vmem:[%s2347_s1 + $0x168] sm:$0xff] }
  0x14   : > { %v526_v61 = vld [vmem:[%s2349_s3 + $0x98] sm:$0xff]  ;;  %v274_v3 = vld [vmem:[%s2347_s1 + $0x10] sm:$0xff]  ;;  %v1452_v4 = vpack.c.bf16 %v522_v60, %v519_v59  ;;  %v277_v5 = vld [vmem:[%s2347_s1 + $0x28] sm:$0xff]  ;;  %v1408_v12 = vpack.c.bf16 %v317_v2, %v314_v1 }
  0x15   : > { %1393 = vmatpush1.bf16.msra.mxu1 %v1392_v26  ;;  %v1454_v6 = vpack.c.bf16 %v529_v62, %v526_v61  ;;  %v525_v8 = vld [vmem:[%s2349_s3 + $0x90] sm:$0xff]  ;;  %v528_v9 = vld [vmem:[%s2349_s3 + $0xa8] sm:$0xff]  ;;  %v535_v11 = vld [vmem:[%s2349_s3 + $0xe0] sm:$0xff]  ;;  %v1410_v13 = vpack.c.bf16 %v277_v5, %v274_v3 }
  0x16   : > { %1395 = vmatprep.subr.bf16.mxu1 %v1394_v27  ;;  %1449 = vmatpush1.bf16.msra.mxu0 %v1448_v56  ;;  %v532_v10 = vld [vmem:[%s2349_s3 + $0xc8] sm:$0xff]  ;;  %v280_v14 = vld [vmem:[%s2347_s1 + $0x40] sm:$0xff]  ;;  %v1456_v15 = vpack.c.bf16 %v528_v9, %v525_v8  ;;  %v283_v16 = vld [vmem:[%s2347_s1 + $0x58] sm:$0xff] }
  0x17   : > { %1451 = vmatprep.subr.bf16.mxu0 %v1450_v58  ;;  %v1458_v17 = vpack.c.bf16 %v535_v11, %v532_v10  ;;  %v531_v18 = vld [vmem:[%s2349_s3 + $0xc0] sm:$0xff]  ;;  %v534_v19 = vld [vmem:[%s2349_s3 + $0xd8] sm:$0xff]  ;;  %v541_v21 = vld [vmem:[%s2349_s3 + $0x110] sm:$0xff]  ;;  %v1414_v23 = vpack.c.bf16 %v283_v16, %v280_v14 }
  0x18   : > { %v538_v20 = vld [vmem:[%s2349_s3 + $0xf8] sm:$0xff]  ;;  %v270_v22 = vld [vmem:[%s256_s25] sm:$0xff]  ;;  %v286_v24 = vld [vmem:[%s2347_s1 + $0x70] sm:$0xff]  ;;  %v1460_v25 = vpack.c.bf16 %v534_v19, %v531_v18 }
  0x19   : > { %1397 = vmatpush1.bf16.msra.mxu1 %v1396_v34  ;;  %v289_v26 = vld [vmem:[%s2347_s1 + $0x88] sm:$0xff]  ;;  %v1462_v27 = vpack.c.bf16 %v541_v21, %v538_v20  ;;  %v537_v28 = vld [vmem:[%s2349_s3 + $0xf0] sm:$0xff]  ;;  %v547_v31 = vld [vmem:[%s2349_s3 + $0x140] sm:$0xff] }
  0x1a   : > { %1399 = vmatprep.subr.bf16.mxu1 %v1398_v38  ;;  %1453 = vmatpush1.bf16.msra.mxu0 %v1452_v4  ;;  %v540_v29 = vld [vmem:[%s2349_s3 + $0x108] sm:$0xff]  ;;  %v1418_v33 = vpack.c.bf16 %v289_v26, %v286_v24  ;;  %v292_v34 = vld [vmem:[%s2347_s1 + $0xa0] sm:$0xff]  ;;  %v295_v36 = vld [vmem:[%s2347_s1 + $0xb8] sm:$0xff] }
  0x1b   : > { %1455 = vmatprep.subr.bf16.mxu0 %v1454_v6  ;;  %v544_v30 = vld [vmem:[%s2349_s3 + $0x128] sm:$0xff]  ;;  %v1464_v35 = vpack.c.bf16 %v540_v29, %v537_v28  ;;  %v543_v38 = vld [vmem:[%s2349_s3 + $0x120] sm:$0xff]  ;;  %v546_v39 = vld [vmem:[%s2349_s3 + $0x138] sm:$0xff]  ;;  %v1422_v42 = vpack.c.bf16 %v295_v36, %v292_v34 }
  0x1c   : > { %v1888_v32 = vld [vmem:[%s256_s25 + $0x8] sm:$0xff]  ;;  %v1466_v37 = vpack.c.bf16 %v547_v31, %v544_v30  ;;  %v550_v40 = vld [vmem:[%s2349_s3 + $0x158] sm:$0xff]  ;;  %v553_v41 = vld [vmem:[%s2349_s3 + $0x170] sm:$0xff]  ;;  %v1468_v44 = vpack.c.bf16 %v546_v39, %v543_v38  ;;  %s1230_s25 = sshll.u32 %s1673_s22, 4  ;;  %s2357_s22 = smov (!%p265_p4, %s1673_s22), 2 }
  0x1d   : > { %1401 = vmatpush1.bf16.msra.mxu1 %v1400_v51  ;;  %v298_v43 = vld [vmem:[%s2347_s1 + $0xd0] sm:$0xff]  ;;  %v301_v45 = vld [vmem:[%s2347_s1 + $0xe8] sm:$0xff]  ;;  %v1470_v46 = vpack.c.bf16 %v553_v41, %v550_v40  ;;  %v559_v50 = vld [vmem:[%s2349_s3 + $0x1a0] sm:$0xff]  ;;  %s1611_s27 = smul.u32 6, %s2357_s22 }
  0x1e   : > { %1403 = vmatprep.subr.bf16.mxu1 %v1402_v52  ;;  %1457 = vmatpush1.bf16.msra.mxu0 %v1456_v15  ;;  %v549_v47 = vld [vmem:[%s2349_s3 + $0x150] sm:$0xff]  ;;  %v552_v48 = vld [vmem:[%s2349_s3 + $0x168] sm:$0xff]  ;;  %v1426_v51 = vpack.c.bf16 %v301_v45, %v298_v43  ;;  %v304_v52 = vld [vmem:[%s2347_s1 + $0x100] sm:$0xff] }
  0x1f   : > { %1459 = vmatprep.subr.bf16.mxu0 %v1458_v17  ;;  %v556_v49 = vld [vmem:[%s2349_s3 + $0x188] sm:$0xff]  ;;  %v1472_v53 = vpack.c.bf16 %v552_v48, %v549_v47  ;;  %v307_v54 = vld [vmem:[%s2347_s1 + $0x118] sm:$0xff]  ;;  %v555_v56 = vld [vmem:[%s2349_s3 + $0x180] sm:$0xff]  ;;  %s269_s23 = scalar_lea.vmem %s2352_s6, %s1611_s27 }
  0x20   : > { %v1474_v55 = vpack.c.bf16 %v559_v50, %v556_v49  ;;  %v558_v57 = vld [vmem:[%s2349_s3 + $0x198] sm:$0xff]  ;;  %v565_v59 = vld [vmem:[%s2349_s3 + $0x1d0] sm:$0xff]  ;;  %v1430_v60 = vpack.c.bf16 %v307_v54, %v304_v52  ;;  %v564_v2 = vld [vmem:[%s2349_s3 + $0x1c8] sm:$0xff] }
  0x21   : > { %1405 = vmatpush1.bf16.msra.mxu1 %v1404_v63  ;;  %v562_v58 = vld [vmem:[%s2349_s3 + $0x1b8] sm:$0xff]  ;;  %v310_v61 = vld [vmem:[%s2347_s1 + $0x130] sm:$0xff]  ;;  %v1476_v62 = vpack.c.bf16 %v558_v57, %v555_v56  ;;  %v313_v63 = vld [vmem:[%s2347_s1 + $0x148] sm:$0xff] }
  0x22   : > { %1407 = vmatprep.subr.bf16.mxu1 %v1406_v0  ;;  %1461 = vmatpush1.bf16.msra.mxu0 %v1460_v25  ;;  %v1478_v0 = vpack.c.bf16 %v565_v59, %v562_v58  ;;  %v561_v1 = vld [vmem:[%s2349_s3 + $0x1b0] sm:$0xff]  ;;  %v568_v3 = vld [vmem:[%s2349_s3 + $0x1e8] sm:$0xff]  ;;  %v571_v4 = vld [vmem:[%s2349_s3 + $0x200] sm:$0xff]  ;;  %v1434_v5 = vpack.c.bf16 %v313_v63, %v310_v61 }
  0x23   : > { %1463 = vmatprep.subr.bf16.mxu0 %v1462_v27  ;;  %v316_v6 = vld [vmem:[%s2347_s1 + $0x160] sm:$0xff]  ;;  %v1480_v8 = vpack.c.bf16 %v564_v2, %v561_v1  ;;  %v319_v9 = vld [vmem:[%s2347_s1 + $0x178] sm:$0xff]  ;;  %v1482_v10 = vpack.c.bf16 %v571_v4, %v568_v3  ;;  %v577_v14 = vld [vmem:[%s2349_s3 + $0x230] sm:$0xff] }
  0x24   : > { %v567_v11 = vld [vmem:[%s2349_s3 + $0x1e0] sm:$0xff]  ;;  %v1438_v15 = vpack.c.bf16 %v319_v9, %v316_v6  ;;  %v557_v16 = vld [vmem:[%s2349_s3 + $0x190] sm:$0xff]  ;;  %v560_v18 = vld [vmem:[%s2349_s3 + $0x1a8] sm:$0xff] }
  0x25   : > { %1409 = vmatpush1.bf16.msra.mxu1 %v1408_v12  ;;  %v570_v12 = vld [vmem:[%s2349_s3 + $0x1f8] sm:$0xff]  ;;  %v573_v20 = vld [vmem:[%s2349_s3 + $0x210] sm:$0xff]  ;;  %v576_v21 = vld [vmem:[%s2349_s3 + $0x228] sm:$0xff]  ;;  %v1538_v24 = vpack.c.bf16 %v560_v18, %v557_v16 }
  0x26   : > { %1411 = vmatprep.subr.bf16.mxu1 %v1410_v13  ;;  %1465 = vmatpush1.bf16.msra.mxu0 %v1464_v35  ;;  %v1484_v17 = vpack.c.bf16 %v570_v12, %v567_v11  ;;  %v509_v25 = vld [vmem:[%s2349_s3 + $0x10] sm:$0xff]  ;;  %v512_v26 = vld [vmem:[%s2349_s3 + $0x28] sm:$0xff]  ;;  %v563_v27 = vld [vmem:[%s2349_s3 + $0x1c0] sm:$0xff]  ;;  %v1488_v28 = vpack.c.bf16 %v576_v21, %v573_v20 }
  0x27   : > { %1467 = vmatprep.subr.bf16.mxu0 %v1466_v37  ;;  %v566_v29 = vld [vmem:[%s2349_s3 + $0x1d8] sm:$0xff]  ;;  %v579_v31 = vld [vmem:[%s2349_s3 + $0x240] sm:$0xff]  ;;  %v589_v35 = vld [vmem:[%s2349_s3 + $0x290] sm:$0xff]  ;;  %v1540_v36 = vpack.c.bf16 %v512_v26, %v509_v25 }
  0x28   : > { %402 = vmatmul.mubr.f32.vlgmr.msra.gmra.mrb[0].mxu1 %v270_v22  ;;  %v586_v34 = vld [vmem:[%s2349_s3 + $0x278] sm:$0xff]  ;;  %v1542_v37 = vpack.c.bf16 %v566_v29, %v563_v27  ;;  %v515_v38 = vld [vmem:[%s2349_s3 + $0x40] sm:$0xff]  ;;  %v569_v40 = vld [vmem:[%s2349_s3 + $0x1f0] sm:$0xff] }
  0x29   : > { %1413 = vmatpush3.bf16.msra.mxu1 %v1410_v13  ;;  %407 = vmatprep.mubr.f32.mxu1 %v1630_v7  ;;  %v574_v13 = vld [vmem:[%s2349_s3 + $0x218] sm:$0xff]  ;;  %v1494_v43 = vpack.c.bf16 %v589_v35, %v586_v34  ;;  %v588_v45 = vld [vmem:[%s2349_s3 + $0x288] sm:$0xff]  ;;  %v595_v47 = vld [vmem:[%s2349_s3 + $0x2c0] sm:$0xff] }
  0x2a   : > { %1415 = vmatprep.subr.bf16.mxu1 %v1414_v23  ;;  %1469 = vmatpush1.bf16.msra.mxu0 %v1468_v44  ;;  %v1486_v19 = vpack.c.bf16 %v577_v14, %v574_v13  ;;  %v518_v39 = vld [vmem:[%s2349_s3 + $0x58] sm:$0xff]  ;;  %v585_v44 = vld [vmem:[%s2349_s3 + $0x270] sm:$0xff]  ;;  %v575_v52 = vld [vmem:[%s2349_s3 + $0x220] sm:$0xff] }
  0x2b   : > { %1471 = vmatprep.subr.bf16.mxu0 %v1470_v46  ;;  %v592_v46 = vld [vmem:[%s2349_s3 + $0x2a8] sm:$0xff]  ;;  %v1544_v48 = vpack.c.bf16 %v518_v39, %v515_v38  ;;  %v521_v50 = vld [vmem:[%s2349_s3 + $0x70] sm:$0xff]  ;;  %v527_v57 = vld [vmem:[%s2349_s3 + $0xa0] sm:$0xff] }
  0x2c   : > { %408 = vmatmul.mubr.f32.gmra.mrb[2].mxu1 %v1888_v32  ;;  %v1498_v54 = vpack.c.bf16 %v595_v47, %v592_v46  ;;  %v530_v58 = vld [vmem:[%s2349_s3 + $0xb8] sm:$0xff]  ;;  %v581_v59 = vld [vmem:[%s2349_s3 + $0x250] sm:$0xff]  ;;  %v587_v1 = vld [vmem:[%s2349_s3 + $0x280] sm:$0xff] }
  0x2d   : > { %1417 = vmatpush3.bf16.msra.mxu1 %v1414_v23  ;;  %1340 = vmatprep.mubr.f32.mxu1 %v270_v22  ;;  %v580_v22 = vld [vmem:[%s2349_s3 + $0x248] sm:$0xff]  ;;  %v583_v23 = vld [vmem:[%s2349_s3 + $0x260] sm:$0xff]  ;;  %v1552_v61 = vpack.c.bf16 %v530_v58, %v527_v57  ;;  %v533_v63 = vld [vmem:[%s2349_s3 + $0xd0] sm:$0xff] }
  0x2e   : > { %1419 = vmatprep.subr.bf16.mxu1 %v1418_v33  ;;  %1473 = vmatpush1.bf16.msra.mxu0 %v1472_v53  ;;  %v1490_v30 = vpack.c.bf16 %v583_v23, %v580_v22  ;;  %v578_v53 = vld [vmem:[%s2349_s3 + $0x238] sm:$0xff]  ;;  %v591_v9 = vld [vmem:[%s2349_s3 + $0x2a0] sm:$0xff]  ;;  %v593_v11 = vld [vmem:[%s2349_s3 + $0x2b0] sm:$0xff] }
  0x2f   : > { %1475 = vmatprep.subr.bf16.mxu0 %v1474_v55  ;;  %v1550_v56 = vpack.c.bf16 %v578_v53, %v575_v52  ;;  %v590_v2 = vld [vmem:[%s2349_s3 + $0x298] sm:$0xff]  ;;  %v596_v13 = vld [vmem:[%s2349_s3 + $0x2c8] sm:$0xff]  ;;  %v545_v14 = vld [vmem:[%s2349_s3 + $0x130] sm:$0xff] }
  0x30   : > { %v1558_v4 = vpack.c.bf16 %v590_v2, %v587_v1  ;;  %v542_v6 = vld [vmem:[%s2349_s3 + $0x118] sm:$0xff]  ;;  %v1562_v16 = vpack.c.bf16 %v596_v13, %v593_v11  ;;  %v597_v21 = vld [vmem:[%s2349_s3 + $0x2d0] sm:$0xff]  ;;  %v600_v22 = vld [vmem:[%s2349_s3 + $0x2e8] sm:$0xff] }
  0x31   : > { %1421 = vmatpush3.bf16.msra.mxu1 %v1418_v33  ;;  %v582_v33 = vld [vmem:[%s2349_s3 + $0x258] sm:$0xff]  ;;  %v599_v23 = vld [vmem:[%s2349_s3 + $0x2e0] sm:$0xff]  ;;  %v605_v34 = vld [vmem:[%s2349_s3 + $0x310] sm:$0xff] }
  0x32   : > { %1423 = vmatprep.subr.bf16.mxu1 %v1422_v42  ;;  %1477 = vmatpush1.bf16.msra.mxu0 %v1476_v62  ;;  %v1492_v41 = vpack.c.bf16 %v582_v33, %v579_v31  ;;  %v598_v18 = vld [vmem:[%s2349_s3 + $0x2d8] sm:$0xff]  ;;  %v551_v26 = vld [vmem:[%s2349_s3 + $0x160] sm:$0xff]  ;;  %v608_v35 = vld [vmem:[%s2349_s3 + $0x328] sm:$0xff] }
  0x33   : > { %1479 = vmatprep.subr.bf16.mxu0 %v1478_v0  ;;  %v536_v0 = vld [vmem:[%s2349_s3 + $0xe8] sm:$0xff]  ;;  %v602_v25 = vld [vmem:[%s2349_s3 + $0x2f8] sm:$0xff]  ;;  %v607_v31 = vld [vmem:[%s2349_s3 + $0x320] sm:$0xff] }
  0x34   : > { %v1556_v3 = vpack.c.bf16 %v536_v0, %v533_v63  ;;  %v554_v27 = vld [vmem:[%s2349_s3 + $0x178] sm:$0xff]  ;;  %v611_v52 = vld [vmem:[%s2349_s3 + $0x340] sm:$0xff]  ;;  %v616_v0 = vld [vmem:[%s2349_s3 + $0x368] sm:$0xff] }
  0x35   : > { %1425 = vmatpush3.bf16.msra.mxu1 %v1422_v42  ;;  %v572_v42 = vld [vmem:[%s2349_s3 + $0x208] sm:$0xff]  ;;  %v1568_v29 = vpack.c.bf16 %v554_v27, %v551_v26  ;;  %v614_v53 = vld [vmem:[%s2349_s3 + $0x358] sm:$0xff]  ;;  %v631_v26 = vld [vmem:[%s2349_s3 + $0x3e0] sm:$0xff] }
  0x36   : > { %1427 = vmatprep.subr.bf16.mxu1 %v1426_v51  ;;  %1481 = vmatpush1.bf16.msra.mxu0 %v1480_v8  ;;  %v1546_v49 = vpack.c.bf16 %v572_v42, %v569_v40  ;;  %v2151_v40 = vld [vmem:[%s2348_s2] sm:$0x7]  ;;  %v1574_v63 = vpack.c.bf16 %v614_v53, %v611_v52  ;;  %v618_v13 = vld [vmem:[%s2349_s3 + $0x378] sm:$0xff]  ;;  %v629_v27 = vld [vmem:[%s2349_s3 + $0x3d0] sm:$0xff] }
  0x37   : > { %1483 = vmatprep.subr.bf16.mxu0 %v1482_v10  ;;  %v594_v10 = vld [vmem:[%s2349_s3 + $0x2b8] sm:$0xff] }
  0x38   : > { %v1500_v12 = vpack.c.bf16 %v594_v10, %v591_v9 }
  0x39   : > { %1429 = vmatpush3.bf16.msra.mxu1 %v1426_v51  ;;  %v1496_v51 = vpack.c.bf16 %v588_v45, %v585_v44 }
  0x3a   : > { %1431 = vmatprep.subr.bf16.mxu1 %v1430_v60  ;;  %1485 = vmatpush1.bf16.msra.mxu0 %v1484_v17 }
  0x3b   : > { %1487 = vmatprep.subr.bf16.mxu0 %v1486_v19  ;;  %v601_v19 = vld [vmem:[%s2349_s3 + $0x2f0] sm:$0xff] }
  0x3c   : > { %v1502_v20 = vpack.c.bf16 %v601_v19, %v598_v18  ;;  %v623_v18 = vld [vmem:[%s2349_s3 + $0x3a0] sm:$0xff]  ;;  %v626_v19 = vld [vmem:[%s2349_s3 + $0x3b8] sm:$0xff] }
  0x3d   : > { %1433 = vmatpush3.bf16.msra.mxu1 %v1430_v60  ;;  %v584_v60 = vld [vmem:[%s2349_s3 + $0x268] sm:$0xff] }
  0x3e   : > { %1435 = vmatprep.subr.bf16.mxu1 %v1434_v5  ;;  %1489 = vmatpush1.bf16.msra.mxu0 %v1488_v28  ;;  %v1554_v62 = vpack.c.bf16 %v584_v60, %v581_v59  ;;  %v1566_v28 = vpack.c.bf16 %v602_v25, %v599_v23  ;;  %v624_v23 = vld [vmem:[%s2349_s3 + $0x3a8] sm:$0xff] }
  0x3f   : > { %1491 = vmatprep.subr.bf16.mxu0 %v1490_v30  ;;  %v604_v30 = vld [vmem:[%s2349_s3 + $0x308] sm:$0xff] }
  0x40   : > { %v1506_v33 = vpack.c.bf16 %v607_v31, %v604_v30  ;;  %v628_v25 = vld [vmem:[%s2349_s3 + $0x3c8] sm:$0xff]  ;;  %v627_v31 = vld [vmem:[%s2349_s3 + $0x3c0] sm:$0xff] }
  0x41   : > { %1437 = vmatpush3.bf16.msra.mxu1 %v1434_v5  ;;  %v539_v5 = vld [vmem:[%s2349_s3 + $0x100] sm:$0xff]  ;;  %v1522_v30 = vpack.c.bf16 %v631_v26, %v628_v25 }
  0x42   : > { %1439 = vmatprep.subr.bf16.mxu1 %v1438_v15  ;;  %1493 = vmatpush1.bf16.msra.mxu0 %v1492_v41  ;;  %v1560_v8 = vpack.c.bf16 %v542_v6, %v539_v5  ;;  %v620_v5 = vld [vmem:[%s2349_s3 + $0x388] sm:$0xff] }
  0x43   : > { %1495 = vmatprep.subr.bf16.mxu0 %v1494_v43 }
  0x45   : > { %1441 = vmatpush3.bf16.msra.mxu1 %v1438_v15  ;;  %v548_v15 = vld [vmem:[%s2349_s3 + $0x148] sm:$0xff] }
  0x46   : > { %1539 = vmatprep.subr.bf16.mxu1 %v1538_v24  ;;  %1497 = vmatpush1.bf16.msra.mxu0 %v1496_v51  ;;  %v1564_v17 = vpack.c.bf16 %v548_v15, %v545_v14  ;;  %v1504_v24 = vpack.c.bf16 %v600_v22, %v597_v21  ;;  %v613_v51 = vld [vmem:[%s2349_s3 + $0x350] sm:$0xff]  ;;  %v622_v15 = vld [vmem:[%s2349_s3 + $0x398] sm:$0xff] }
  0x47   : > { %1499 = vmatprep.subr.bf16.mxu0 %v1498_v54  ;;  %v621_v22 = vld [vmem:[%s2349_s3 + $0x390] sm:$0xff] }
  0x48   : > { %1341 = vmatmul.mubr.f32.vlgmr.msra.gmra.mrb[4].mxu1 %v1888_v32  ;;  %v524_v32 = vld [vmem:[%s2349_s3 + $0x88] sm:$0xff] }
  0x49   : > { %1541 = vmatpush3.bf16.msra.mxu1 %v1540_v36  ;;  %v1548_v55 = vpack.c.bf16 %v524_v32, %v521_v50  ;;  %v1570_v36 = vpack.c.bf16 %v608_v35, %v605_v34  ;;  %v610_v50 = vld [vmem:[%s2349_s3 + $0x338] sm:$0xff] }
  0x4a   : > { %1543 = vmatprep.subr.bf16.mxu1 %v1542_v37  ;;  %1501 = vmatpush1.bf16.msra.mxu0 %v1500_v12  ;;  %v322_v37 = vlaneseq  ;;  %v1510_v60 = vpack.c.bf16 %v613_v51, %v610_v50  ;;  %v615_v12 = vld [vmem:[%s2349_s3 + $0x360] sm:$0xff]  ;;  %v634_v35 = vld [vmem:[%s2349_s3 + $0x3f8] sm:$0xff]  ;;  %v644_v51 = vld [vmem:[%s2349_s3 + $0x448] sm:$0xff] }
  0x4b   : > { %1503 = vmatprep.subr.bf16.mxu0 %v1502_v20  ;;  %v1516_v20 = vpack.c.bf16 %v618_v13, %v615_v12  ;;  %v643_v50 = vld [vmem:[%s2349_s3 + $0x440] sm:$0xff] }
  0x4c   : > { %v2145_v38 = vshrl.u32 %v322_v37, 7  ;;  %vm1068_vm15 = vcmp.lt.s32.totalorder %v322_v37, 288 }
  0x4d   : > { %1545 = vmatpush3.bf16.msra.mxu1 %v1544_v48  ;;  %v603_v48 = vld [vmem:[%s2349_s3 + $0x300] sm:$0xff] }
  0x4e   : > { %1547 = vmatprep.subr.bf16.mxu1 %v1546_v49  ;;  %1505 = vmatpush1.bf16.msra.mxu0 %v1504_v24  ;;  %v324_v39 = vsub.s32 0, %v2145_v38  ;;  %v328_v41 = vsub.s32 1, %v2145_v38  ;;  %v606_v49 = vld [vmem:[%s2349_s3 + $0x318] sm:$0xff]  ;;  %v1582_v24 = vpack.c.bf16 %v626_v19, %v623_v18  ;;  %v332_v53 = vsub.s32 2, %v2145_v38  ;;  %v651_v19 = vld [vmem:[%s2350_s4] sm:$0x7] }
  0x4f   : > { %1507 = vmatprep.subr.bf16.mxu0 %v1506_v33  ;;  %v630_v33 = vld [vmem:[%s2349_s3 + $0x3d8] sm:$0xff] }
  0x50   : > { %v325_v42 = vrot.slane %v2151_v40, %v324_v39  ;;  %v329_v43 = vrot.slane %v2151_v40, %v328_v41 }
  0x51   : > { %1549 = vmatpush3.bf16.msra.mxu1 %v1548_v55 }
  0x52   : > { %1551 = vmatprep.subr.bf16.mxu1 %v1550_v56  ;;  %v1508_v56 = vpack.c.bf16 %v606_v49, %v603_v48  ;;  %v640_v49 = vld [vmem:[%s2349_s3 + $0x428] sm:$0xff] }
  0x55   : > { %1553 = vmatpush3.bf16.msra.mxu1 %v1552_v61  ;;  %v609_v61 = vld [vmem:[%s2349_s3 + $0x330] sm:$0xff] }
  0x56   : > { %1555 = vmatprep.subr.bf16.mxu1 %v1554_v62  ;;  %v612_v62 = vld [vmem:[%s2349_s3 + $0x348] sm:$0xff] }
  0x57   : > { %v1512_v9 = vpack.c.bf16 %v612_v62, %v609_v61  ;;  %v650_v61 = vld [vmem:[%s2349_s3 + $0x478] sm:$0xff]  ;;  %v333_v62 = vrot.slane %v2151_v40, %v332_v53 }
  0x59   : > { %1557 = vmatpush3.bf16.msra.mxu1 %v1556_v3  ;;  %v619_v3 = vld [vmem:[%s2349_s3 + $0x380] sm:$0xff] }
  0x5a   : > { %1559 = vmatprep.subr.bf16.mxu1 %v1558_v4  ;;  %v617_v4 = vld [vmem:[%s2349_s3 + $0x370] sm:$0xff]  ;;  %v1514_v11 = vpack.c.bf16 %v619_v3, %v616_v0 }
  0x5b   : > { %v1578_v14 = vpack.c.bf16 %v620_v5, %v617_v4 }
  0x5d   : > { %1561 = vmatpush3.bf16.msra.mxu1 %v1560_v8 }
  0x5e   : > { %1563 = vmatprep.subr.bf16.mxu1 %v1562_v16 }
  0x61   : > { %1565 = vmatpush3.bf16.msra.mxu1 %v1564_v17  ;;  %v625_v17 = vld [vmem:[%s2349_s3 + $0x3b0] sm:$0xff] }
  0x62   : > { %1567 = vmatprep.subr.bf16.mxu1 %v1566_v28  ;;  %v1518_v21 = vpack.c.bf16 %v625_v17, %v622_v15  ;;  %v632_v28 = vld [vmem:[%s2349_s3 + $0x3e8] sm:$0xff] }
  0x63   : > { %v1586_v34 = vpack.c.bf16 %v632_v28, %v629_v27 }
  0x65   : > { %1569 = vmatpush3.bf16.msra.mxu1 %v1568_v29  ;;  %v1520_v29 = vpack.c.bf16 %v624_v23, %v621_v22  ;;  %v664_v22 = vrot.slane %v651_v19, %v332_v53  ;;  %v660_v23 = vrot.slane %v651_v19, %v328_v41 }
  0x66   : > { %1571 = vmatprep.subr.bf16.mxu1 %v1570_v36 }
  0xfb   : > { %v403_v44 = vpop.f32.mrb[0].mxu1 }
  0xfc   : > { %v404_v45 = vadd.f32 %v403_v44, %v325_v42  ;;  %v405_v46 = vpop.f32.mrb[1].mxu1  ;;  %v1524_v44 = vpack.c.bf16 %v630_v33, %v627_v31 }
  0xfd   : > { %v406_v47 = vadd.f32 %v405_v46, %v329_v43  ;;  %v633_v46 = vld [vmem:[%s2349_s3 + $0x3f0] sm:$0xff] }
  0xfe   : > { %v495_v32 = vmul.f32 0.01, %v404_v45  ;;  %vm489_vm1 = vcmp.gt.f32.partialorder %v404_v45, 0.0 }
  0xff   : > { %vm490_vm0 = vcmp.gt.f32.partialorder %v406_v47, 0.0  ;;  %v496_v54 = vmul.f32 0.01, %v406_v47  ;;  %v409_v55 = vpop.f32.mrb[2].mxu1 }
 0x100   : > { %v410_v57 = vadd.f32 %v409_v55, %v325_v42  ;;  %v411_v58 = vpop.f32.mrb[3].mxu1  ;;  %v501_v2 = vsel %vm489_vm1, %v404_v45, %v495_v32  ;;  %v635_v42 = vld [vmem:[%s2349_s3 + $0x400] sm:$0xff]  ;;  %v641_v32 = vld [vmem:[%s2349_s3 + $0x430] sm:$0xff] }
 0x101   : > { %v502_v59 = vsel %vm490_vm0, %v406_v47, %v496_v54  ;;  %v412_v1 = vadd.f32 %v411_v58, %v329_v43  ;;  %v638_v43 = vld [vmem:[%s2349_s3 + $0x418] sm:$0xff]  ;;  %v636_v47 = vld [vmem:[%s2349_s3 + $0x408] sm:$0xff]  ;;  %v1530_v54 = vpack.c.bf16 %v643_v50, %v640_v49  ;;  %v639_v55 = vld [vmem:[%s2349_s3 + $0x420] sm:$0xff] }
 0x102   : > { %732 = vmatprep.mubr.f32.mxu0 %v502_v59  ;;  %886 = vmatprep.mubr.f32.mxu1 %v502_v59  ;;  %v498_v6 = vmul.f32 0.01, %v410_v57  ;;  %vm492_vm2 = vcmp.gt.f32.partialorder %v410_v57, 0.0  ;;  %v1590_v48 = vpack.c.bf16 %v638_v43, %v635_v42  ;;  %v1528_v52 = vpack.c.bf16 %v636_v47, %v633_v46  ;;  %v646_v58 = vld [vmem:[%s2349_s3 + $0x458] sm:$0xff]  ;;  %v649_v59 = vld [vmem:[%s2349_s3 + $0x470] sm:$0xff] }
 0x103   : > { %733 = vmatmul.mubr.f32.vlgmr.msra.gmra.mrb[0].mxu0 %v501_v2  ;;  %887 = vmatmul.mubr.f32.vlgmr.msra.gmra.mrb[6].mxu1 %v501_v2  ;;  %v499_v8 = vmul.f32 0.01, %v412_v1  ;;  %vm493_vm3 = vcmp.gt.f32.partialorder %v412_v1, 0.0  ;;  %v1534_v0 = vpack.c.bf16 %v649_v59, %v646_v58  ;;  %v648_v2 = vld [vmem:[%s2349_s3 + $0x468] sm:$0xff] }
 0x104   : > { %1509 = vmatpush1.bf16.msra.mxu0 %v1508_v56  ;;  %1573 = vmatpush3.bf16.msra.mxu1 %v1570_v36  ;;  %v504_v10 = vsel %vm492_vm2, %v410_v57, %v498_v6  ;;  %v637_v36 = vld [vmem:[%s2349_s3 + $0x410] sm:$0xff]  ;;  %v642_v56 = vld [vmem:[%s2349_s3 + $0x438] sm:$0xff]  ;;  %v1594_v57 = vpack.c.bf16 %v644_v51, %v641_v32 }
 0x105   : > { %1511 = vmatprep.subr.bf16.mxu0 %v1510_v60  ;;  %1575 = vmatprep.subr.bf16.mxu1 %v1574_v63  ;;  %v505_v16 = vsel %vm493_vm3, %v412_v1, %v499_v8  ;;  %v1526_v45 = vpack.c.bf16 %v637_v36, %v634_v35  ;;  %v647_v60 = vld [vmem:[%s2349_s3 + $0x460] sm:$0xff]  ;;  %v645_v1 = vld [vmem:[%s2349_s3 + $0x450] sm:$0xff] }
 0x106   : > { %891 = vmatprep.mubr.f32.mxu1 %v505_v16  ;;  %738 = vmatprep.mubr.f32.mxu0 %v505_v16  ;;  %v1598_v3 = vpack.c.bf16 %v650_v61, %v647_v60  ;;  %v1536_v8 = vpack.c.bf16 %v648_v2, %v645_v1 }
 0x107   : > { %892 = vmatmul.mubr.f32.gmra.mrb[8].mxu1 %v504_v10  ;;  %739 = vmatmul.mubr.f32.gmra.mrb[2].mxu0 %v504_v10 }
 0x108   : > { %1513 = vmatpush1.bf16.msra.mxu0 %v1512_v9  ;;  %1577 = vmatpush3.bf16.msra.mxu1 %v1574_v63  ;;  %v1532_v63 = vpack.c.bf16 %v642_v56, %v639_v55 }
 0x109   : > { %1515 = vmatprep.subr.bf16.mxu0 %v1514_v11  ;;  %1579 = vmatprep.subr.bf16.mxu1 %v1578_v14 }
 0x10a   : > { %809 = vmatprep.mubr.f32.mxu0 %v1630_v7 }
 0x10c   : > { %1517 = vmatpush1.bf16.msra.mxu0 %v1516_v20  ;;  %1581 = vmatpush3.bf16.msra.mxu1 %v1578_v14  ;;  %v999_v20 = vadd.s32 8, %v2145_v38 }
 0x10d   : > { %1519 = vmatprep.subr.bf16.mxu0 %v1518_v21  ;;  %1583 = vmatprep.subr.bf16.mxu1 %v1582_v24  ;;  %v1001_v21 = vstv %s1230_s25 }
 0x110   : > { %1521 = vmatpush1.bf16.msra.mxu0 %v1520_v29  ;;  %1585 = vmatpush3.bf16.msra.mxu1 %v1582_v24  ;;  %v2305_v24 = vadd.s32 %v1001_v21, %v999_v20 }
 0x111   : > { %1523 = vmatprep.subr.bf16.mxu0 %v1522_v30  ;;  %1587 = vmatprep.subr.bf16.mxu1 %v1586_v34  ;;  %v1002_v30 = vadd.s32 %v1001_v21, %v2145_v38 }
 0x112   : > { %vm1005_vm7 = vcmp.lt.s32.totalorder %v2305_v24, 40 }
 0x113   : > { %vm1004_vm12 = vcmp.lt.s32.totalorder %v1002_v30, 40 }
 0x114   : > { %1525 = vmatpush1.bf16.msra.mxu0 %v1524_v44  ;;  %1589 = vmatpush3.bf16.msra.mxu1 %v1586_v34 }
 0x115   : > { %1527 = vmatprep.subr.bf16.mxu0 %v1526_v45  ;;  %1591 = vmatprep.subr.bf16.mxu1 %v1590_v48 }
 0x118   : > { %1529 = vmatpush1.bf16.msra.mxu0 %v1528_v52  ;;  %1593 = vmatpush3.bf16.msra.mxu1 %v1590_v48 }
 0x119   : > { %1531 = vmatprep.subr.bf16.mxu0 %v1530_v54  ;;  %1595 = vmatprep.subr.bf16.mxu1 %v1594_v57 }
 0x11b   : > { %v1342_v4 = vpop.f32.mrb[4].mxu1 }
 0x11c   : > { %v486_v5 = vadd.f32 %v1342_v4, %v333_v62  ;;  %1533 = vmatpush1.bf16.msra.mxu0 %v1532_v63  ;;  %v480_v6 = vpop.f32.mrb[5].mxu1  ;;  %1597 = vmatpush3.bf16.msra.mxu1 %v1594_v57 }
 0x11d   : > { %v481_v40 = vadd.f32 %v480_v6, %v333_v62  ;;  %1535 = vmatprep.subr.bf16.mxu0 %v1534_v0  ;;  %1599 = vmatprep.subr.bf16.mxu1 %v1598_v3 }
 0x11e   : > { %v500_v9 = vmul.f32 0.01, %v486_v5  ;;  %vm494_vm4 = vcmp.gt.f32.partialorder %v486_v5, 0.0 }
 0x11f   : > { %vm491_vm5 = vcmp.gt.f32.partialorder %v481_v40, 0.0  ;;  %v497_v10 = vmul.f32 0.01, %v481_v40 }
 0x120   : > { %1537 = vmatpush1.bf16.msra.mxu0 %v1536_v8  ;;  %1601 = vmatpush3.bf16.msra.mxu1 %v1598_v3  ;;  %v506_v12 = vsel %vm494_vm4, %v486_v5, %v500_v9 }
 0x121   : > { %v503_v11 = vsel %vm491_vm5, %v481_v40, %v497_v10 }
 0x122   : > { %1375 = vmatprep.mubr.f32.mxu1 %v503_v11 }
 0x123   : > { %810 = vmatmul.mubr.f32.vlgmr.msra.gmra.mrb[0].mxu0 %v503_v11  ;;  %1376 = vmatmul.mubr.f32.vlgmr.msra.gmra.mrb[10].mxu1 %v506_v12 }
 0x124   : > { %815 = vmatprep.mubr.f32.mxu0 %v1630_v7  ;;  %v656_v7 = vrot.slane %v651_v19, %v324_v39 }
 0x127   : > { %816 = vmatmul.mubr.f32.gmra.mrb[2].mxu0 %v506_v12 }
 0x1d6   : > { %v1284_v13 = vpop.f32.mrb[6].mxu1 }
 0x1d7   : > { %v1285_v14 = vpop.f32.mrb[7].mxu1 }
 0x1d8   : > { %v1286_v15 = vadd.f32 %v1285_v14, %v1284_v13 }
 0x1da   : > { %v1287_v16 = vpop.f32.mrb[8].mxu1  ;;  %v889_v28 = vadd.f32 %v1286_v15, %v664_v22 }
 0x1db   : > { %v1288_v17 = vpop.f32.mrb[9].mxu1 }
 0x1dc   : > { %v1289_v18 = vadd.f32 %v1288_v17, %v1287_v16 }
 0x1de   : > { %v894_v25 = vadd.f32 %v1289_v18, %v664_v22 }
 0x1f6   : > { %v811_v26 = vpop.f32.mrb[0].mxu0  ;;  %v1377_v27 = vpop.f32.mrb[10].mxu1 }
 0x1f7   : > { %v1602_v29 = vadd.f32 %v811_v26, %v656_v7  ;;  %v813_v31 = vpop.f32.mrb[1].mxu0  ;;  %v969_v33 = vadd.f32 %v1377_v27, %v894_v25  ;;  %v963_v34 = vpop.f32.mrb[11].mxu1 }
 0x1f8   : > { %v1603_v35 = vadd.f32 %v813_v31, %v660_v23  ;;  %v964_v39 = vadd.f32 %v963_v34, %v889_v28 }
 0x1f9   : > { %vm972_vm8 = vcmp.gt.f32.partialorder %v1602_v29, 0.0  ;;  %v978_v41 = vmul.f32 0.01, %v1602_v29  ;;  %vm977_vm9 = vcmp.gt.f32.partialorder %v969_v33, 0.0  ;;  %v983_v36 = vmul.f32 0.01, %v969_v33 }
 0x1fa   : > { %vm973_vm10 = vcmp.gt.f32.partialorder %v1603_v35, 0.0  ;;  %v979_v42 = vmul.f32 0.01, %v1603_v35  ;;  %vm974_vm11 = vcmp.gt.f32.partialorder %v964_v39, 0.0  ;;  %v980_v43 = vmul.f32 0.01, %v964_v39 }
 0x1fb   : > { %v984_v44 = vsel %vm972_vm8, %v1602_v29, %v978_v41  ;;  %v989_v45 = vsel %vm977_vm9, %v969_v33, %v983_v36  ;;  %v817_v46 = vpop.f32.mrb[2].mxu0 }
 0x1fc   : > { %990 = vst [vmem:[%s2313_s18] sm:$0xff] %v984_v44  ;;  %v985_v47 = vsel %vm973_vm10, %v1603_v35, %v979_v42  ;;  %v1015_v48 = vsel %vm1005_vm7, %v989_v45, 0.0  ;;  %v986_v49 = vsel %vm974_vm11, %v964_v39, %v980_v43  ;;  %v819_v50 = vpop.f32.mrb[3].mxu0  ;;  %996 = vst.msk [vmem:[%s2313_s18 + $0x28] sm:$0xff] %vm992_vm6, %v989_v45  ;;  %v1604_v53 = vadd.f32 %v817_v46, %v656_v7 }
 0x1fd   : > { %991 = vst [vmem:[%s2313_s18 + $0x8] sm:$0xff] %v985_v47  ;;  %v1031_v32 = vsel %vm992_vm6, %v1015_v48, 0.0  ;;  %v1076_v51 = vmul.f32 %v1015_v48, %v1015_v48  ;;  %993 = vst.msk [vmem:[%s2313_s18 + $0x10] sm:$0xff] %vm992_vm6, %v986_v49  ;;  %v1012_v52 = vsel %vm1004_vm12, %v986_v49, 0.0  ;;  %v1605_v54 = vadd.f32 %v819_v50, %v660_v23 }
 0x1fe   : > { %v1010_v55 = vsel %vm1004_vm12, %v984_v44, 0.0  ;;  %v1030_v57 = vsel %vm992_vm6, %v1012_v52, 0.0  ;;  %v1073_v58 = vmul.f32 %v1012_v52, %v1012_v52  ;;  %vm975_vm13 = vcmp.gt.f32.partialorder %v1604_v53, 0.0 }
 0x1ff   : > { %v1092_v56 = vsel %vm992_vm6, %v1076_v51, 0.0  ;;  %v1032_v59 = vadd.f32 %v1031_v32, %v1030_v57  ;;  %v981_v60 = vmul.f32 0.01, %v1604_v53  ;;  %vm976_vm14 = vcmp.gt.f32.partialorder %v1605_v54, 0.0 }
 0x200   : > { %v1091_v61 = vsel %vm992_vm6, %v1073_v58, 0.0  ;;  %v982_v62 = vmul.f32 0.01, %v1605_v54  ;;  %v1071_v2 = vmul.f32 %v1010_v55, %v1010_v55  ;;  %v1011_v3 = vsel %vm1004_vm12, %v985_v47, 0.0 }
 0x201   : > { %v1033_v63 = vrot.slane %v1032_v59, 4  ;;  %v1093_v0 = vadd.f32 %v1092_v56, %v1091_v61  ;;  %v987_v1 = vsel %vm975_vm13, %v1604_v53, %v981_v60  ;;  %v1072_v14 = vmul.f32 %v1011_v3, %v1011_v3 }
 0x202   : > { %994 = vst [vmem:[%s2313_s18 + $0x18] sm:$0xff] %v987_v1  ;;  %v1013_v4 = vsel %vm1005_vm7, %v987_v1, 0.0  ;;  %v988_v5 = vsel %vm976_vm14, %v1605_v54, %v982_v62  ;;  %v1631_v7 = vmov 1966171168  }
 0x203   : > { %v1034_v6 = vadd.f32 %v1033_v63, %v1032_v59  ;;  %v1094_v8 = vrot.slane %v1093_v0, 4  ;;  %v1016_v40 = vadd.f32 %v1013_v4, %v1010_v55  ;;  %v1074_v9 = vmul.f32 %v1013_v4, %v1013_v4  ;;  %995 = vst [vmem:[%s2313_s18 + $0x20] sm:$0xff] %v988_v5 }
 0x204   : > { %v1014_v10 = vsel %vm1005_vm7, %v988_v5, 0.0  ;;  %v1044_v23 = vunpack.c.l.s4 %v1631_v7 }
 0x205   : > { %v1095_v11 = vadd.f32 %v1094_v8, %v1093_v0  ;;  %v1017_v12 = vrot.slane %v1016_v40, 4  ;;  %v1077_v13 = vadd.f32 %v1074_v9, %v1071_v2  ;;  %v1035_v15 = vrot.slane %v1034_v6, 2 }
 0x206   : > { %v1023_v16 = vadd.f32 %v1014_v10, %v1011_v3  ;;  %v1075_v17 = vmul.f32 %v1014_v10, %v1014_v10  ;;  %v1045_v35 = vunpack.c.0.s8 %v1044_v23 }
 0x207   : > { %v1018_v18 = vadd.f32 %v1017_v12, %v1016_v40  ;;  %v1078_v19 = vrot.slane %v1077_v13, 4  ;;  %v1096_v20 = vrot.slane %v1095_v11, 2  ;;  %v1036_v27 = vadd.f32 %v1035_v15, %v1034_v6 }
 0x208   : > { %v1024_v21 = vrot.slane %v1023_v16, 4  ;;  %v1084_v22 = vadd.f32 %v1075_v17, %v1072_v14  ;;  %v1048_v49 = vsub.s32 %v1045_v35, %v2145_v38 }
 0x209   : > { %v1019_v25 = vrot.slane %v1018_v18, 2  ;;  %v1079_v26 = vadd.f32 %v1078_v19, %v1077_v13  ;;  %v1097_v31 = vadd.f32 %v1096_v20, %v1095_v11  ;;  %v1037_v36 = vrot.slane %v1036_v27, 1 }
 0x20a   : > { %v1025_v24 = vadd.f32 %v1024_v21, %v1023_v16  ;;  %v1085_v28 = vrot.slane %v1084_v22, 4 }
 0x20b   : > { %v1020_v29 = vadd.f32 %v1019_v25, %v1018_v18  ;;  %v1080_v30 = vrot.slane %v1079_v26, 2  ;;  %v1098_v45 = vrot.slane %v1097_v31, 1  ;;  %v1038_v50 = vadd.f32 %v1037_v36, %v1036_v27 }
 0x20c   : > { %v1026_v33 = vrot.slane %v1025_v24, 2  ;;  %v1086_v34 = vadd.f32 %v1085_v28, %v1084_v22 }
 0x20d   : > { %v1021_v39 = vrot.slane %v1020_v29, 1  ;;  %v1081_v41 = vadd.f32 %v1080_v30, %v1079_v26  ;;  %v1099_v53 = vadd.f32 %v1098_v45, %v1097_v31  ;;  %v1056_v56 = vrot.slane %v1038_v50, %v1048_v49 }
 0x20e   : > { %v1027_v42 = vadd.f32 %v1026_v33, %v1025_v24  ;;  %v1087_v43 = vrot.slane %v1086_v34, 2 }
 0x20f   : > { %v1082_v44 = vrot.slane %v1081_v41, 1  ;;  %v1022_v46 = vadd.f32 %v1021_v39, %v1020_v29  ;;  %v1117_v59 = vrot.slane %v1099_v53, %v1048_v49 }
 0x210   : > { %v1028_v47 = vrot.slane %v1027_v42, 1  ;;  %v1088_v48 = vadd.f32 %v1087_v43, %v1086_v34 }
 0x211   : > { %v1083_v32 = vadd.f32 %v1082_v44, %v1081_v41 }
 0x212   : > { %v1029_v51 = vadd.f32 %v1028_v47, %v1027_v42  ;;  %v1089_v52 = vrot.slane %v1088_v48, 1 }
 0x214   : > { %v1042_v54 = vcombine.low %v1022_v46, %v1029_v51  ;;  %v1090_v55 = vadd.f32 %v1089_v52, %v1088_v48 }
 0x216   : > { %v1049_v57 = vrot.slane %v1042_v54, %v1048_v49  ;;  %v1103_v58 = vcombine.low %v1083_v32, %v1090_v55 }
 0x218   : > { %v1057_v60 = vcombine.low %v1049_v57, %v1056_v56  ;;  %v1110_v61 = vrot.slane %v1103_v58, %v1048_v49 }
 0x21a   : > { %v1064_v38 = vrot.slane %v1057_v60, %v1048_v49  ;;  %v1118_v62 = vcombine.low %v1110_v61, %v1117_v59 }
 0x21c   : > { %1070 = vst.msk [vmem:[%s269_s23] ss:$2 sm:$0x7] %vm1068_vm15, %v1064_v38  ;;  %v1125_v63 = vrot.slane %v1118_v62, %v1048_v49 }
 0x21e   : > { %1231 = vst.msk [vmem:[%s269_s23 + $0x1] ss:$2 sm:$0x7] %vm1068_vm15, %v1125_v63 }
 0x21f PF: > { %s17_s21 = sadd.s32 1, %s1628_s21  }
 0x220   : > { %p14_p5 = scmp.ge.s32.totalorder %s17_s21, 5  }
 0x222   :  { %16 = sbr.rel (!%p14_p5) target bundleno = 1 (0x1), region = 83 }

</bundles_post_ra>
